<compile_context>
chip_gen: v6e
topology: v6e:2x2x1
jax: 0.10.0
libtpu: 0.0.40
codegen_flags: <defaults>
</compile_context>

<pallas_src>
import functools

import jax
import jax.numpy as jnp
from jax.experimental import pallas as pl
from jax.experimental.pallas import tpu as pltpu

EPS = 1e-5  # PyTorch GroupNorm default


# ----------------------------------------------------------------------------
# Kernel
# ----------------------------------------------------------------------------
def _resnet_block_kernel(x_ref, e1_ref, g1_ref, b1_ref, m1_ref, cb1_ref,
                         e2_ref, g2_ref, b2_ref, m2_ref, cb2_ref,
                         mr_ref, rb_ref, o_ref, *, bn, H, inv_n1, inv_n2):
    """One grid step = `bn` images, lane-dense (bn*H, W*C) layout.

    x_ref   : (bn*H, W*C_in)         input rows, lane l = w*C_in + c
    e*_ref  : (G, W*C)               one-hot group selector per lane (f32)
    g*/b*   : (1, W*C)               GroupNorm gamma/beta, pre-tiled over W (f32)
    m*_ref  : (3*W*C, W*C_out)       folded 3x3 conv weights, bf16, rows ordered
                                     [dy=0 | dy=1 | dy=2], each block-tridiagonal
                                     over W with horizontal padding baked in
    cb*_ref : (1, W*C_out)           conv bias, pre-tiled over W (f32)
    mr_ref  : (W*C_in, W*C_out)      block-diagonal 1x1 residual conv weight, bf16
    rb_ref  : (1, W*C_out)           residual conv bias (zeros if Identity)
    o_ref   : (bn*H, W*C_out)        output
    """
    f32 = jnp.float32
    bf16 = jnp.bfloat16
    R = bn * H

    x = x_ref[...].astype(f32)                                  # (R, W*C_in)

    # Row masks for the vertical (dy) shifts: zero the shifted rows at image
    # boundaries (encodes the conv's vertical zero padding and prevents images
    # within the block from bleeding into each other).
    row = jax.lax.broadcasted_iota(jnp.int32, (R, 1), 0)
    row_in_img = row % H
    not_top = row_in_img != 0                                   # (R, 1) bool
    not_bot = row_in_img != (H - 1)

    def gn_swish(t2, e_ref, gamma_ref, beta_ref, inv_n):
        """GroupNorm (per image, per group) + Swish; all math in f32."""
        e = e_ref[...]                                          # (G, W*C)
        wc = t2.shape[-1]
        t3 = t2.reshape(bn, H, wc)                              # per-image view
        col_s = jnp.sum(t3, axis=1)                             # (bn, W*C)
        col_q = jnp.sum(t3 * t3, axis=1)                        # (bn, W*C)
        mu = jnp.sum(col_s[:, None, :] * e[None], axis=-1) * inv_n   # (bn, G)
        ex2 = jnp.sum(col_q[:, None, :] * e[None], axis=-1) * inv_n  # (bn, G)
        var = jnp.maximum(ex2 - mu * mu, 0.0)
        inv = jax.lax.rsqrt(var + EPS)                          # (bn, G)
        # Broadcast group stats back to lanes via the same one-hot selector.
        mu_l = jnp.sum(mu[:, :, None] * e[None], axis=1)        # (bn, W*C)
        inv_l = jnp.sum(inv[:, :, None] * e[None], axis=1)      # (bn, W*C)
        # Fused affine: y = t*scale + shift  (2 full-tile VPU ops, not 4).
        scale = inv_l * gamma_ref[...]                          # (bn, W*C)
        shift = beta_ref[...] - mu_l * scale                    # (bn, W*C)
        y = t3 * scale[:, None, :] + shift[:, None, :]
        # Swish: exp on the EUP, approx reciprocal on the EUP (no VALU divide).
        y = y * pl.reciprocal(1.0 + jnp.exp(-y), approx=True)
        return y.reshape(R, wc)

    def conv3x3(t2, m_ref, bias_ref):
        # Vertical taps via XLU roll + boundary mask; horizontal taps and
        # horizontal padding live inside m_ref.  Single MXU matmul, K = 3*W*C.
        t_up = jnp.where(not_top, pltpu.roll(t2, 1, axis=0), 0.0)      # rows i-1
        t_dn = jnp.where(not_bot, pltpu.roll(t2, R - 1, axis=0), 0.0)  # rows i+1
        taps = jnp.concatenate([t_up, t2, t_dn], axis=1).astype(bf16)  # (R, 3*W*C)
        out = jnp.dot(taps, m_ref[...], preferred_element_type=f32)
        return out + bias_ref[...]

    # Block 1: GN -> Swish -> (Dropout(0) = Identity) -> Conv3x3
    y1 = gn_swish(x, e1_ref, g1_ref, b1_ref, inv_n1)
    h1 = conv3x3(y1, m1_ref, cb1_ref)                           # (R, W*C_out)

    # Block 2
    y2 = gn_swish(h1, e2_ref, g2_ref, b2_ref, inv_n2)
    h2 = conv3x3(y2, m2_ref, cb2_ref)                           # (R, W*C_out)

    # Residual 1x1 conv (block-diagonal over W) on the original input.
    res = jnp.dot(x.astype(bf16), mr_ref[...], preferred_element_type=f32)
    res = res + rb_ref[...]

    o_ref[...] = (h2 + res).astype(o_ref.dtype)


# ----------------------------------------------------------------------------
# One-time (per parameter update) weight folding / layout preparation
# ----------------------------------------------------------------------------
def _group_selector(C, groups, W):
    """(groups, W*C) one-hot matrix: 1.0 where lane w*C+c belongs to the group."""
    cg = C // groups
    lane_group = (jnp.arange(W * C) % C) // cg
    return (lane_group[None, :] == jnp.arange(groups)[:, None]).astype(jnp.float32)


def _conv3x3_lane_weights(w_hwio, W, dtype):
    """Fold the horizontal taps of a 3x3 conv into lane weights.

    w_hwio: (3, 3, C_in, C_out)  ->  (3*W*C_in, W*C_out).
    For cross-correlation (PyTorch Conv2d / lax.conv):
      M[dy*W*C_in + src*C_in + ci, dst*C_out + co] = w[dy, src - dst + 1, ci, co]
    for 0 <= src - dst + 1 <= 2, else 0 (encodes the horizontal zero padding).
    """
    _, _, c_in, c_out = w_hwio.shape
    src = jnp.arange(W)[:, None]                    # input column
    dst = jnp.arange(W)[None, :]                    # output column
    kx = src - dst + 1                              # (W, W)
    valid = ((kx >= 0) & (kx <= 2)).astype(jnp.float32)
    kx_c = jnp.clip(kx, 0, 2)
    mats = []
    for dy in range(3):
        blocks = w_hwio[dy].astype(jnp.float32)[kx_c]          # (W, W, Cin, Cout)
        blocks = blocks * valid[:, :, None, None]
        mats.append(jnp.transpose(blocks, (0, 2, 1, 3)).reshape(W * c_in, W * c_out))
    return jnp.stack(mats, axis=0).reshape(3 * W * c_in, W * c_out).astype(dtype)


def prepare_resnet_block_params(p, *, H, W, groups, matmul_dtype=jnp.bfloat16):
    """Fold / tile all weights once.  Call per parameter update, not per forward."""
    C_in = p["gamma1"].shape[0]
    C_out = p["b1"].shape[0]
    assert C_in % groups == 0 and C_out % groups == 0
    wc_in, wc_out = W * C_in, W * C_out

    def tile_row(v):  # per-channel param -> per-lane row (1, W*C)
        return jnp.tile(v.astype(jnp.float32), W)[None, :]

    if p.get("w_res") is not None:
        # block-diagonal 1x1 conv: Mres[s*Cin+ci, s*Cout+co] = w_res[ci, co]
        mres = jnp.einsum("sj,io->sijo", jnp.eye(W, dtype=jnp.float32),
                          p["w_res"].astype(jnp.float32)).reshape(wc_in, wc_out)
        rbias = p["b_res"]
    else:
        assert C_in == C_out
        # TODO(synk): skip the identity-residual matmul entirely (add x directly).
        mres = jnp.eye(wc_in, dtype=jnp.float32)
        rbias = jnp.zeros((C_out,), jnp.float32)

    return dict(
        e1=_group_selector(C_in, groups, W),
        g1=tile_row(p["gamma1"]), b1=tile_row(p["beta1"]),
        m1=_conv3x3_lane_weights(p["w1"], W, matmul_dtype),      # (3*W*Cin, W*Cout)
        cb1=tile_row(p["b1"]),
        e2=_group_selector(C_out, groups, W),
        g2=tile_row(p["gamma2"]), b2=tile_row(p["beta2"]),
        m2=_conv3x3_lane_weights(p["w2"], W, matmul_dtype),      # (3*W*Cout, W*Cout)
        cb2=tile_row(p["b2"]),
        mres=mres.astype(matmul_dtype), rbias=tile_row(rbias),
        meta=dict(H=H, W=W, C_in=C_in, C_out=C_out, groups=groups),
    )


# ----------------------------------------------------------------------------
# Forward wrappers
# ----------------------------------------------------------------------------
def resnet_block_apply_lane(x_lane, prep, *, N, block_n=None):
    """Lane-dense entry point: x_lane is (N*H, W*C_in) f32, returns (N*H, W*C_out)."""
    meta = prep["meta"]
    H, W = meta["H"], meta["W"]
    C_in, C_out, groups = meta["C_in"], meta["C_out"], meta["groups"]
    wc_in, wc_out = W * C_in, W * C_out

    bn = N if block_n is None else block_n       # images per grid step
    assert N % bn == 0
    R = bn * H
    assert R % 8 == 0, "block rows must be a multiple of 8 (sublane tiling)"
    assert wc_in % 128 == 0 and wc_out % 128 == 0, "W*C must be a multiple of 128"
    assert x_lane.shape == (N * H, wc_in)

    kernel = functools.partial(
        _resnet_block_kernel, bn=bn, H=H,
        inv_n1=1.0 / float(H * W * (C_in // groups)),
        inv_n2=1.0 / float(H * W * (C_out // groups)))

    const2 = lambda n: (0, 0)
    return pl.pallas_call(
        kernel,
        out_shape=jax.ShapeDtypeStruct((N * H, wc_out), jnp.float32),
        grid_spec=pltpu.PrefetchScalarGridSpec(
            num_scalar_prefetch=0,
            grid=(N // bn,),
            in_specs=[
                pl.BlockSpec((R, wc_in), lambda n: (n, 0)),            # x
                pl.BlockSpec((groups, wc_in), const2),                 # e1
                pl.BlockSpec((1, wc_in), const2),                      # gamma1
                pl.BlockSpec((1, wc_in), const2),                      # beta1
                pl.BlockSpec((3 * wc_in, wc_out), const2),             # m1 (bf16)
                pl.BlockSpec((1, wc_out), const2),                     # conv1 bias
                pl.BlockSpec((groups, wc_out), const2),                # e2
                pl.BlockSpec((1, wc_out), const2),                     # gamma2
                pl.BlockSpec((1, wc_out), const2),                     # beta2
                pl.BlockSpec((3 * wc_out, wc_out), const2),            # m2 (bf16)
                pl.BlockSpec((1, wc_out), const2),                     # conv2 bias
                pl.BlockSpec((wc_in, wc_out), const2),                 # res weight
                pl.BlockSpec((1, wc_out), const2),                     # res bias
            ],
            out_specs=pl.BlockSpec((R, wc_out), lambda n: (n, 0)),
        ),
        compiler_params=pltpu.CompilerParams(
            dimension_semantics=("parallel",)),
    )(x_lane, prep["e1"], prep["g1"], prep["b1"], prep["m1"], prep["cb1"],
      prep["e2"], prep["g2"], prep["b2"], prep["m2"], prep["cb2"],
      prep["mres"], prep["rbias"])


def resnet_block_forward(x_nchw, prep, *, block_n=None):
    """NCHW adapter (matches the PyTorch module's interface).

    Note: the two transposes below each cost an HBM round trip; prefer
    `resnet_block_apply_lane` when neighbouring ops can use the lane layout.
    """
    N, C_in, H, W = x_nchw.shape
    meta = prep["meta"]
    assert (C_in, H, W) == (meta["C_in"], meta["H"], meta["W"])
    C_out = meta["C_out"]
    x_l = jnp.transpose(x_nchw, (0, 2, 3, 1)).reshape(N * H, W * C_in)
    x_l = x_l.astype(jnp.float32)
    out_l = resnet_block_apply_lane(x_l, prep, N=N, block_n=block_n)
    return jnp.transpose(out_l.reshape(N, H, W, C_out), (0, 3, 1, 2))


# ----------------------------------------------------------------------------
# Pure-JAX reference (mirrors the PyTorch module)
# ----------------------------------------------------------------------------
def resnet_block_reference(x, p, *, groups):
    def gn_swish(t, gamma, beta):
        n, c, h, w = t.shape
        cg = c // groups
        tg = t.reshape(n, groups, cg, h, w)
        mu = tg.mean(axis=(2, 3, 4), keepdims=True)
        var = tg.var(axis=(2, 3, 4), keepdims=True)
        tn = ((tg - mu) / jnp.sqrt(var + EPS)).reshape(n, c, h, w)
        tn = tn * gamma[None, :, None, None] + beta[None, :, None, None]
        return tn * jax.nn.sigmoid(tn)

    def conv3x3(t, w_hwio, b):
        w_oihw = jnp.transpose(w_hwio, (3, 2, 0, 1))
        out = jax.lax.conv_general_dilated(
            t, w_oihw, window_strides=(1, 1), padding="SAME",
            dimension_numbers=("NCHW", "OIHW", "NCHW"))
        return out + b[None, :, None, None]

    h = conv3x3(gn_swish(x, p["gamma1"], p["beta1"]), p["w1"], p["b1"])
    h = conv3x3(gn_swish(h, p["gamma2"], p["beta2"]), p["w2"], p["b2"])
    res = jnp.einsum("nchw,co->nohw", x, p["w_res"]) + p["b_res"][None, :, None, None]
    return h + res


# ----------------------------------------------------------------------------
# Test
# ----------------------------------------------------------------------------
if __name__ == "__main__":
    # ResnetBlock(dim=8, dim_out=16, norm_groups=4), small spatial size.
    N, C_in, H, W = 2, 8, 16, 16
    C_out, groups = 16, 4

    key = jax.random.PRNGKey(0)
    ks = jax.random.split(key, 11)

    x = jax.random.normal(ks[0], (N, C_in, H, W), dtype=jnp.float32)
    params = dict(
        gamma1=1.0 + 0.1 * jax.random.normal(ks[1], (C_in,), jnp.float32),
        beta1=0.1 * jax.random.normal(ks[2], (C_in,), jnp.float32),
        w1=0.1 * jax.random.normal(ks[3], (3, 3, C_in, C_out), jnp.float32),
        b1=0.1 * jax.random.normal(ks[4], (C_out,), jnp.float32),
        gamma2=1.0 + 0.1 * jax.random.normal(ks[5], (C_out,), jnp.float32),
        beta2=0.1 * jax.random.normal(ks[6], (C_out,), jnp.float32),
        w2=0.1 * jax.random.normal(ks[7], (3, 3, C_out, C_out), jnp.float32),
        b2=0.1 * jax.random.normal(ks[8], (C_out,), jnp.float32),
        w_res=0.1 * jax.random.normal(ks[9], (C_in, C_out), jnp.float32),
        b_res=0.1 * jax.random.normal(ks[10], (C_out,), jnp.float32),
    )

    # Fold / tile the weights once (hoisted out of the per-forward path).
    prep = prepare_resnet_block_params(params, H=H, W=W, groups=groups)

    out = resnet_block_forward(x, prep)
    out = jax.block_until_ready(out)

    ref = resnet_block_reference(x, params, groups=groups)
    assert out.shape == (N, C_out, H, W)
    err = jnp.max(jnp.abs(out - ref))
    # bf16 MXU operands (+ approx reciprocal in Swish) vs. the f32 reference:
    # expected max abs error ~1e-2 at these magnitudes.
    assert jnp.allclose(out, ref, atol=3e-2, rtol=3e-2), f"max abs err = {err}"

    print("KERNEL_OK")
</pallas_src>

<mosaic_0001>
module attributes {stable_mosaic.version = 11 : i64} {
  func.func @_resnet_block_kernel(%arg0: i32, %arg1: memref<32x128xf32, #tpu.memory_space<vmem>>, %arg2: memref<4x128xf32, #tpu.memory_space<vmem>>, %arg3: memref<1x128xf32, #tpu.memory_space<vmem>>, %arg4: memref<1x128xf32, #tpu.memory_space<vmem>>, %arg5: memref<384x256xbf16, #tpu.memory_space<vmem>>, %arg6: memref<1x256xf32, #tpu.memory_space<vmem>>, %arg7: memref<4x256xf32, #tpu.memory_space<vmem>>, %arg8: memref<1x256xf32, #tpu.memory_space<vmem>>, %arg9: memref<1x256xf32, #tpu.memory_space<vmem>>, %arg10: memref<768x256xbf16, #tpu.memory_space<vmem>>, %arg11: memref<1x256xf32, #tpu.memory_space<vmem>>, %arg12: memref<128x256xbf16, #tpu.memory_space<vmem>>, %arg13: memref<1x256xf32, #tpu.memory_space<vmem>>, %arg14: memref<32x256xf32, #tpu.memory_space<vmem>>) attributes {dimension_semantics = [#tpu.dimension_semantics<parallel>], iteration_bounds = array<i64: 1>, scalar_prefetch = 0 : i64, scratch_operands = 0 : i64, tpu.core_type = #tpu.core_type<tc>, window_params = [{transform_indices = @transform_0, window_bounds = array<i64: 32, 128>}, {pipeline_mode = #tpu.pipeline_mode<synchronous>, transform_indices = @transform_1, window_bounds = array<i64: 4, 128>}, {pipeline_mode = #tpu.pipeline_mode<synchronous>, transform_indices = @transform_2, window_bounds = array<i64: 1, 128>}, {pipeline_mode = #tpu.pipeline_mode<synchronous>, transform_indices = @transform_3, window_bounds = array<i64: 1, 128>}, {pipeline_mode = #tpu.pipeline_mode<synchronous>, transform_indices = @transform_4, window_bounds = array<i64: 384, 256>}, {pipeline_mode = #tpu.pipeline_mode<synchronous>, transform_indices = @transform_5, window_bounds = array<i64: 1, 256>}, {pipeline_mode = #tpu.pipeline_mode<synchronous>, transform_indices = @transform_6, window_bounds = array<i64: 4, 256>}, {pipeline_mode = #tpu.pipeline_mode<synchronous>, transform_indices = @transform_7, window_bounds = array<i64: 1, 256>}, {pipeline_mode = #tpu.pipeline_mode<synchronous>, transform_indices = @transform_8, window_bounds = array<i64: 1, 256>}, {pipeline_mode = #tpu.pipeline_mode<synchronous>, transform_indices = @transform_9, window_bounds = array<i64: 768, 256>}, {pipeline_mode = #tpu.pipeline_mode<synchronous>, transform_indices = @transform_10, window_bounds = array<i64: 1, 256>}, {pipeline_mode = #tpu.pipeline_mode<synchronous>, transform_indices = @transform_11, window_bounds = array<i64: 128, 256>}, {pipeline_mode = #tpu.pipeline_mode<synchronous>, transform_indices = @transform_12, window_bounds = array<i64: 1, 256>}, {transform_indices = @transform_13, window_bounds = array<i64: 32, 256>}]} {
    %c0 = arith.constant 0 : index
    %c0_0 = arith.constant 0 : index
    %0 = vector.load %arg1[%c0, %c0_0] : memref<32x128xf32, #tpu.memory_space<vmem>>, vector<32x128xf32>
    %1 = tpu.iota {dimensions = array<i32: 0>} : vector<32x1xi32>
    %c16_i32 = arith.constant 16 : i32
    %c0_i32 = arith.constant 0 : i32
    %2 = arith.cmpi eq, %c16_i32, %c0_i32 : i32
    %c1_i32 = arith.constant 1 : i32
    %3 = arith.select %2, %c1_i32, %c16_i32 : i32
    %4 = vector.broadcast %3 : i32 to vector<32x1xi32>
    %5 = arith.remsi %1, %4 : vector<32x1xi32>
    %c0_i32_1 = arith.constant 0 : i32
    %6 = vector.broadcast %c0_i32_1 : i32 to vector<32x1xi32>
    %7 = arith.cmpi ne, %5, %6 : vector<32x1xi32>
    %c0_i32_2 = arith.constant 0 : i32
    %8 = vector.broadcast %c0_i32_2 : i32 to vector<32x1xi32>
    %9 = arith.cmpi slt, %5, %8 : vector<32x1xi32>
    %c0_i32_3 = arith.constant 0 : i32
    %10 = arith.cmpi slt, %3, %c0_i32_3 : i32
    %11 = vector.broadcast %10 : i1 to vector<32x1xi1>
    %12 = vector.broadcast %11 : vector<32x1xi1> to vector<32x1xi1>
    %13 = arith.xori %9, %12 : vector<32x1xi1>
    %14 = arith.andi %13, %7 : vector<32x1xi1>
    %15 = vector.broadcast %3 : i32 to vector<32x1xi32>
    %16 = arith.addi %5, %15 : vector<32x1xi32>
    %17 = arith.select %14, %16, %5 : vector<32x1xi1>, vector<32x1xi32>
    %c0_i32_4 = arith.constant 0 : i32
    %18 = vector.broadcast %c0_i32_4 : i32 to vector<32x1xi32>
    %19 = arith.cmpi ne, %17, %18 : vector<32x1xi32>
    %c15_i32 = arith.constant 15 : i32
    %20 = vector.broadcast %c15_i32 : i32 to vector<32x1xi32>
    %21 = arith.cmpi ne, %17, %20 : vector<32x1xi32>
    %c0_5 = arith.constant 0 : index
    %c0_6 = arith.constant 0 : index
    %22 = vector.load %arg2[%c0_5, %c0_6] : memref<4x128xf32, #tpu.memory_space<vmem>>, vector<4x128xf32>
    %23 = vector.shape_cast %0 : vector<32x128xf32> to vector<2x16x128xf32>
    %cst = arith.constant dense<0.000000e+00> : vector<2x128xf32>
    %24 = vector.multi_reduction <add>, %23, %cst [1] : vector<2x16x128xf32> to vector<2x128xf32>
    %25 = arith.mulf %23, %23 : vector<2x16x128xf32>
    %cst_7 = arith.constant dense<0.000000e+00> : vector<2x128xf32>
    %26 = vector.multi_reduction <add>, %25, %cst_7 [1] : vector<2x16x128xf32> to vector<2x128xf32>
    %27 = vector.shape_cast %24 : vector<2x128xf32> to vector<2x1x128xf32>
    %28 = vector.shape_cast %22 : vector<4x128xf32> to vector<1x4x128xf32>
    %29 = vector.broadcast %27 : vector<2x1x128xf32> to vector<2x4x128xf32>
    %30 = vector.broadcast %28 : vector<1x4x128xf32> to vector<2x4x128xf32>
    %31 = arith.mulf %29, %30 : vector<2x4x128xf32>
    %cst_8 = arith.constant dense<0.000000e+00> : vector<2x4xf32>
    %32 = vector.multi_reduction <add>, %31, %cst_8 [2] : vector<2x4x128xf32> to vector<2x4xf32>
    %cst_9 = arith.constant 0.001953125 : f32
    %33 = vector.broadcast %cst_9 : f32 to vector<2x4xf32>
    %34 = arith.mulf %32, %33 : vector<2x4xf32>
    %35 = vector.shape_cast %26 : vector<2x128xf32> to vector<2x1x128xf32>
    %36 = vector.shape_cast %22 : vector<4x128xf32> to vector<1x4x128xf32>
    %37 = vector.broadcast %35 : vector<2x1x128xf32> to vector<2x4x128xf32>
    %38 = vector.broadcast %36 : vector<1x4x128xf32> to vector<2x4x128xf32>
    %39 = arith.mulf %37, %38 : vector<2x4x128xf32>
    %cst_10 = arith.constant dense<0.000000e+00> : vector<2x4xf32>
    %40 = vector.multi_reduction <add>, %39, %cst_10 [2] : vector<2x4x128xf32> to vector<2x4xf32>
    %cst_11 = arith.constant 0.001953125 : f32
    %41 = vector.broadcast %cst_11 : f32 to vector<2x4xf32>
    %42 = arith.mulf %40, %41 : vector<2x4xf32>
    %43 = arith.mulf %34, %34 : vector<2x4xf32>
    %44 = arith.subf %42, %43 : vector<2x4xf32>
    %cst_12 = arith.constant 0.000000e+00 : f32
    %45 = vector.broadcast %cst_12 : f32 to vector<2x4xf32>
    %46 = arith.maximumf %44, %45 : vector<2x4xf32>
    %cst_13 = arith.constant 9.99999974E-6 : f32
    %47 = vector.broadcast %cst_13 : f32 to vector<2x4xf32>
    %48 = arith.addf %46, %47 : vector<2x4xf32>
    %49 = math.rsqrt %48 : vector<2x4xf32>
    %50 = vector.shape_cast %34 : vector<2x4xf32> to vector<2x4x1xf32>
    %51 = vector.shape_cast %22 : vector<4x128xf32> to vector<1x4x128xf32>
    %52 = vector.broadcast %50 : vector<2x4x1xf32> to vector<2x4x128xf32>
    %53 = vector.broadcast %51 : vector<1x4x128xf32> to vector<2x4x128xf32>
    %54 = arith.mulf %52, %53 : vector<2x4x128xf32>
    %cst_14 = arith.constant dense<0.000000e+00> : vector<2x128xf32>
    %55 = vector.multi_reduction <add>, %54, %cst_14 [1] : vector<2x4x128xf32> to vector<2x128xf32>
    %56 = vector.shape_cast %49 : vector<2x4xf32> to vector<2x4x1xf32>
    %57 = vector.shape_cast %22 : vector<4x128xf32> to vector<1x4x128xf32>
    %58 = vector.broadcast %56 : vector<2x4x1xf32> to vector<2x4x128xf32>
    %59 = vector.broadcast %57 : vector<1x4x128xf32> to vector<2x4x128xf32>
    %60 = arith.mulf %58, %59 : vector<2x4x128xf32>
    %cst_15 = arith.constant dense<0.000000e+00> : vector<2x128xf32>
    %61 = vector.multi_reduction <add>, %60, %cst_15 [1] : vector<2x4x128xf32> to vector<2x128xf32>
    %c0_16 = arith.constant 0 : index
    %c0_17 = arith.constant 0 : index
    %62 = vector.load %arg3[%c0_16, %c0_17] : memref<1x128xf32, #tpu.memory_space<vmem>>, vector<1x128xf32>
    %63 = vector.broadcast %62 : vector<1x128xf32> to vector<2x128xf32>
    %64 = arith.mulf %61, %63 : vector<2x128xf32>
    %c0_18 = arith.constant 0 : index
    %c0_19 = arith.constant 0 : index
    %65 = vector.load %arg4[%c0_18, %c0_19] : memref<1x128xf32, #tpu.memory_space<vmem>>, vector<1x128xf32>
    %66 = arith.mulf %55, %64 : vector<2x128xf32>
    %67 = vector.broadcast %65 : vector<1x128xf32> to vector<2x128xf32>
    %68 = arith.subf %67, %66 : vector<2x128xf32>
    %69 = vector.shape_cast %64 : vector<2x128xf32> to vector<2x1x128xf32>
    %70 = vector.broadcast %69 : vector<2x1x128xf32> to vector<2x16x128xf32>
    %71 = arith.mulf %23, %70 : vector<2x16x128xf32>
    %72 = vector.shape_cast %68 : vector<2x128xf32> to vector<2x1x128xf32>
    %73 = vector.broadcast %72 : vector<2x1x128xf32> to vector<2x16x128xf32>
    %74 = arith.addf %71, %73 : vector<2x16x128xf32>
    %cst_20 = arith.constant 0.000000e+00 : f32
    %75 = vector.broadcast %cst_20 : f32 to vector<2x16x128xf32>
    %76 = arith.subf %75, %74 : vector<2x16x128xf32>
    %77 = math.exp %76 : vector<2x16x128xf32>
    %cst_21 = arith.constant 1.000000e+00 : f32
    %78 = vector.broadcast %cst_21 : f32 to vector<2x16x128xf32>
    %79 = arith.addf %78, %77 : vector<2x16x128xf32>
    %80 = tpu.reciprocal %79 {approx = true} : vector<2x16x128xf32> -> vector<2x16x128xf32>
    %81 = arith.mulf %74, %80 : vector<2x16x128xf32>
    %82 = vector.shape_cast %81 : vector<2x16x128xf32> to vector<32x128xf32>
    %c1_i32_22 = arith.constant 1 : i32
    %83 = tpu.dynamic_rotate %82 by %c1_i32_22 dim 0 : vector<32x128xf32>, i32 -> vector<32x128xf32>
    %cst_23 = arith.constant 0.000000e+00 : f32
    %84 = vector.shape_cast %19 : vector<32x1xi1> to vector<32x1xi1>
    %85 = vector.broadcast %84 : vector<32x1xi1> to vector<32x128xi1>
    %86 = vector.broadcast %cst_23 : f32 to vector<32x128xf32>
    %87 = arith.select %85, %83, %86 : vector<32x128xi1>, vector<32x128xf32>
    %c31_i32 = arith.constant 31 : i32
    %88 = tpu.dynamic_rotate %82 by %c31_i32 dim 0 : vector<32x128xf32>, i32 -> vector<32x128xf32>
    %cst_24 = arith.constant 0.000000e+00 : f32
    %89 = vector.shape_cast %21 : vector<32x1xi1> to vector<32x1xi1>
    %90 = vector.broadcast %89 : vector<32x1xi1> to vector<32x128xi1>
    %91 = vector.broadcast %cst_24 : f32 to vector<32x128xf32>
    %92 = arith.select %90, %88, %91 : vector<32x128xi1>, vector<32x128xf32>
    %93 = tpu.concatenate %87, %82, %92 in 1 : vector<32x128xf32>, vector<32x128xf32>, vector<32x128xf32> -> vector<32x384xf32>
    %94 = arith.truncf %93 : vector<32x384xf32> to vector<32x384xbf16>
    %c0_25 = arith.constant 0 : index
    %c0_26 = arith.constant 0 : index
    %95 = vector.load %arg5[%c0_25, %c0_26] : memref<384x256xbf16, #tpu.memory_space<vmem>>, vector<384x256xbf16>
    %cst_27 = arith.constant dense<0.000000e+00> : vector<32x256xf32>
    %96 = tpu.matmul %94, %95, %cst_27 {dimension_numbers = #tpu.dot_dimension_numbers<[1], [0], [0], [1], [0, 0, 1, 1], [], []>} : vector<32x384xbf16>, vector<384x256xbf16>, vector<32x256xf32> -> vector<32x256xf32>
    %c0_28 = arith.constant 0 : index
    %c0_29 = arith.constant 0 : index
    %97 = vector.load %arg6[%c0_28, %c0_29] : memref<1x256xf32, #tpu.memory_space<vmem>>, vector<1x256xf32>
    %98 = vector.broadcast %97 : vector<1x256xf32> to vector<32x256xf32>
    %99 = arith.addf %96, %98 : vector<32x256xf32>
    %c0_30 = arith.constant 0 : index
    %c0_31 = arith.constant 0 : index
    %100 = vector.load %arg7[%c0_30, %c0_31] : memref<4x256xf32, #tpu.memory_space<vmem>>, vector<4x256xf32>
    %101 = vector.shape_cast %99 : vector<32x256xf32> to vector<2x16x256xf32>
    %cst_32 = arith.constant dense<0.000000e+00> : vector<2x256xf32>
    %102 = vector.multi_reduction <add>, %101, %cst_32 [1] : vector<2x16x256xf32> to vector<2x256xf32>
    %103 = arith.mulf %101, %101 : vector<2x16x256xf32>
    %cst_33 = arith.constant dense<0.000000e+00> : vector<2x256xf32>
    %104 = vector.multi_reduction <add>, %103, %cst_33 [1] : vector<2x16x256xf32> to vector<2x256xf32>
    %105 = vector.shape_cast %102 : vector<2x256xf32> to vector<2x1x256xf32>
    %106 = vector.shape_cast %100 : vector<4x256xf32> to vector<1x4x256xf32>
    %107 = vector.broadcast %105 : vector<2x1x256xf32> to vector<2x4x256xf32>
    %108 = vector.broadcast %106 : vector<1x4x256xf32> to vector<2x4x256xf32>
    %109 = arith.mulf %107, %108 : vector<2x4x256xf32>
    %cst_34 = arith.constant dense<0.000000e+00> : vector<2x4xf32>
    %110 = vector.multi_reduction <add>, %109, %cst_34 [2] : vector<2x4x256xf32> to vector<2x4xf32>
    %cst_35 = arith.constant 9.765625E-4 : f32
    %111 = vector.broadcast %cst_35 : f32 to vector<2x4xf32>
    %112 = arith.mulf %110, %111 : vector<2x4xf32>
    %113 = vector.shape_cast %104 : vector<2x256xf32> to vector<2x1x256xf32>
    %114 = vector.shape_cast %100 : vector<4x256xf32> to vector<1x4x256xf32>
    %115 = vector.broadcast %113 : vector<2x1x256xf32> to vector<2x4x256xf32>
    %116 = vector.broadcast %114 : vector<1x4x256xf32> to vector<2x4x256xf32>
    %117 = arith.mulf %115, %116 : vector<2x4x256xf32>
    %cst_36 = arith.constant dense<0.000000e+00> : vector<2x4xf32>
    %118 = vector.multi_reduction <add>, %117, %cst_36 [2] : vector<2x4x256xf32> to vector<2x4xf32>
    %cst_37 = arith.constant 9.765625E-4 : f32
    %119 = vector.broadcast %cst_37 : f32 to vector<2x4xf32>
    %120 = arith.mulf %118, %119 : vector<2x4xf32>
    %121 = arith.mulf %112, %112 : vector<2x4xf32>
    %122 = arith.subf %120, %121 : vector<2x4xf32>
    %cst_38 = arith.constant 0.000000e+00 : f32
    %123 = vector.broadcast %cst_38 : f32 to vector<2x4xf32>
    %124 = arith.maximumf %122, %123 : vector<2x4xf32>
    %cst_39 = arith.constant 9.99999974E-6 : f32
    %125 = vector.broadcast %cst_39 : f32 to vector<2x4xf32>
    %126 = arith.addf %124, %125 : vector<2x4xf32>
    %127 = math.rsqrt %126 : vector<2x4xf32>
    %128 = vector.shape_cast %112 : vector<2x4xf32> to vector<2x4x1xf32>
    %129 = vector.shape_cast %100 : vector<4x256xf32> to vector<1x4x256xf32>
    %130 = vector.broadcast %128 : vector<2x4x1xf32> to vector<2x4x256xf32>
    %131 = vector.broadcast %129 : vector<1x4x256xf32> to vector<2x4x256xf32>
    %132 = arith.mulf %130, %131 : vector<2x4x256xf32>
    %cst_40 = arith.constant dense<0.000000e+00> : vector<2x256xf32>
    %133 = vector.multi_reduction <add>, %132, %cst_40 [1] : vector<2x4x256xf32> to vector<2x256xf32>
    %134 = vector.shape_cast %127 : vector<2x4xf32> to vector<2x4x1xf32>
    %135 = vector.shape_cast %100 : vector<4x256xf32> to vector<1x4x256xf32>
    %136 = vector.broadcast %134 : vector<2x4x1xf32> to vector<2x4x256xf32>
    %137 = vector.broadcast %135 : vector<1x4x256xf32> to vector<2x4x256xf32>
    %138 = arith.mulf %136, %137 : vector<2x4x256xf32>
    %cst_41 = arith.constant dense<0.000000e+00> : vector<2x256xf32>
    %139 = vector.multi_reduction <add>, %138, %cst_41 [1] : vector<2x4x256xf32> to vector<2x256xf32>
    %c0_42 = arith.constant 0 : index
    %c0_43 = arith.constant 0 : index
    %140 = vector.load %arg8[%c0_42, %c0_43] : memref<1x256xf32, #tpu.memory_space<vmem>>, vector<1x256xf32>
    %141 = vector.broadcast %140 : vector<1x256xf32> to vector<2x256xf32>
    %142 = arith.mulf %139, %141 : vector<2x256xf32>
    %c0_44 = arith.constant 0 : index
    %c0_45 = arith.constant 0 : index
    %143 = vector.load %arg9[%c0_44, %c0_45] : memref<1x256xf32, #tpu.memory_space<vmem>>, vector<1x256xf32>
    %144 = arith.mulf %133, %142 : vector<2x256xf32>
    %145 = vector.broadcast %143 : vector<1x256xf32> to vector<2x256xf32>
    %146 = arith.subf %145, %144 : vector<2x256xf32>
    %147 = vector.shape_cast %142 : vector<2x256xf32> to vector<2x1x256xf32>
    %148 = vector.broadcast %147 : vector<2x1x256xf32> to vector<2x16x256xf32>
    %149 = arith.mulf %101, %148 : vector<2x16x256xf32>
    %150 = vector.shape_cast %146 : vector<2x256xf32> to vector<2x1x256xf32>
    %151 = vector.broadcast %150 : vector<2x1x256xf32> to vector<2x16x256xf32>
    %152 = arith.addf %149, %151 : vector<2x16x256xf32>
    %cst_46 = arith.constant 0.000000e+00 : f32
    %153 = vector.broadcast %cst_46 : f32 to vector<2x16x256xf32>
    %154 = arith.subf %153, %152 : vector<2x16x256xf32>
    %155 = math.exp %154 : vector<2x16x256xf32>
    %cst_47 = arith.constant 1.000000e+00 : f32
    %156 = vector.broadcast %cst_47 : f32 to vector<2x16x256xf32>
    %157 = arith.addf %156, %155 : vector<2x16x256xf32>
    %158 = tpu.reciprocal %157 {approx = true} : vector<2x16x256xf32> -> vector<2x16x256xf32>
    %159 = arith.mulf %152, %158 : vector<2x16x256xf32>
    %160 = vector.shape_cast %159 : vector<2x16x256xf32> to vector<32x256xf32>
    %c1_i32_48 = arith.constant 1 : i32
    %161 = tpu.dynamic_rotate %160 by %c1_i32_48 dim 0 : vector<32x256xf32>, i32 -> vector<32x256xf32>
    %cst_49 = arith.constant 0.000000e+00 : f32
    %162 = vector.shape_cast %19 : vector<32x1xi1> to vector<32x1xi1>
    %163 = vector.broadcast %162 : vector<32x1xi1> to vector<32x256xi1>
    %164 = vector.broadcast %cst_49 : f32 to vector<32x256xf32>
    %165 = arith.select %163, %161, %164 : vector<32x256xi1>, vector<32x256xf32>
    %c31_i32_50 = arith.constant 31 : i32
    %166 = tpu.dynamic_rotate %160 by %c31_i32_50 dim 0 : vector<32x256xf32>, i32 -> vector<32x256xf32>
    %cst_51 = arith.constant 0.000000e+00 : f32
    %167 = vector.shape_cast %21 : vector<32x1xi1> to vector<32x1xi1>
    %168 = vector.broadcast %167 : vector<32x1xi1> to vector<32x256xi1>
    %169 = vector.broadcast %cst_51 : f32 to vector<32x256xf32>
    %170 = arith.select %168, %166, %169 : vector<32x256xi1>, vector<32x256xf32>
    %171 = tpu.concatenate %165, %160, %170 in 1 : vector<32x256xf32>, vector<32x256xf32>, vector<32x256xf32> -> vector<32x768xf32>
    %172 = arith.truncf %171 : vector<32x768xf32> to vector<32x768xbf16>
    %c0_52 = arith.constant 0 : index
    %c0_53 = arith.constant 0 : index
    %173 = vector.load %arg10[%c0_52, %c0_53] : memref<768x256xbf16, #tpu.memory_space<vmem>>, vector<768x256xbf16>
    %cst_54 = arith.constant dense<0.000000e+00> : vector<32x256xf32>
    %174 = tpu.matmul %172, %173, %cst_54 {dimension_numbers = #tpu.dot_dimension_numbers<[1], [0], [0], [1], [0, 0, 1, 1], [], []>} : vector<32x768xbf16>, vector<768x256xbf16>, vector<32x256xf32> -> vector<32x256xf32>
    %c0_55 = arith.constant 0 : index
    %c0_56 = arith.constant 0 : index
    %175 = vector.load %arg11[%c0_55, %c0_56] : memref<1x256xf32, #tpu.memory_space<vmem>>, vector<1x256xf32>
    %176 = vector.broadcast %175 : vector<1x256xf32> to vector<32x256xf32>
    %177 = arith.addf %174, %176 : vector<32x256xf32>
    %178 = arith.truncf %0 : vector<32x128xf32> to vector<32x128xbf16>
    %c0_57 = arith.constant 0 : index
    %c0_58 = arith.constant 0 : index
    %179 = vector.load %arg12[%c0_57, %c0_58] : memref<128x256xbf16, #tpu.memory_space<vmem>>, vector<128x256xbf16>
    %cst_59 = arith.constant dense<0.000000e+00> : vector<32x256xf32>
    %180 = tpu.matmul %178, %179, %cst_59 {dimension_numbers = #tpu.dot_dimension_numbers<[1], [0], [0], [1], [0, 0, 1, 1], [], []>} : vector<32x128xbf16>, vector<128x256xbf16>, vector<32x256xf32> -> vector<32x256xf32>
    %c0_60 = arith.constant 0 : index
    %c0_61 = arith.constant 0 : index
    %181 = vector.load %arg13[%c0_60, %c0_61] : memref<1x256xf32, #tpu.memory_space<vmem>>, vector<1x256xf32>
    %182 = vector.broadcast %181 : vector<1x256xf32> to vector<32x256xf32>
    %183 = arith.addf %180, %182 : vector<32x256xf32>
    %184 = arith.addf %177, %183 : vector<32x256xf32>
    %c0_62 = arith.constant 0 : index
    %c0_63 = arith.constant 0 : index
    %185 = vector.load %arg14[%c0_62, %c0_63] : memref<32x256xf32, #tpu.memory_space<vmem>>, vector<32x256xf32>
    tpu.vector_store %arg14[%c0_62, %c0_63], %184 {strides = array<i32>} : memref<32x256xf32, #tpu.memory_space<vmem>>, vector<32x256xf32>,
    return
  }
  func.func @transform_0(%arg0: i32) -> (i32, i32) {
    %c0_i32 = arith.constant 0 : i32
    %c0_i32_0 = arith.constant 0 : i32
    return %arg0, %c0_i32 : i32, i32
  }
  func.func @transform_1(%arg0: i32) -> (i32, i32) {
    %c0_i32 = arith.constant 0 : i32
    %c0_i32_0 = arith.constant 0 : i32
    %c0_i32_1 = arith.constant 0 : i32
    return %c0_i32, %c0_i32_0 : i32, i32
  }
  func.func @transform_2(%arg0: i32) -> (i32, i32) {
    %c0_i32 = arith.constant 0 : i32
    %c0_i32_0 = arith.constant 0 : i32
    %c0_i32_1 = arith.constant 0 : i32
    return %c0_i32, %c0_i32_0 : i32, i32
  }
  func.func @transform_3(%arg0: i32) -> (i32, i32) {
    %c0_i32 = arith.constant 0 : i32
    %c0_i32_0 = arith.constant 0 : i32
    %c0_i32_1 = arith.constant 0 : i32
    return %c0_i32, %c0_i32_0 : i32, i32
  }
  func.func @transform_4(%arg0: i32) -> (i32, i32) {
    %c0_i32 = arith.constant 0 : i32
    %c0_i32_0 = arith.constant 0 : i32
    %c0_i32_1 = arith.constant 0 : i32
    return %c0_i32, %c0_i32_0 : i32, i32
  }
  func.func @transform_5(%arg0: i32) -> (i32, i32) {
    %c0_i32 = arith.constant 0 : i32
    %c0_i32_0 = arith.constant 0 : i32
    %c0_i32_1 = arith.constant 0 : i32
    return %c0_i32, %c0_i32_0 : i32, i32
  }
  func.func @transform_6(%arg0: i32) -> (i32, i32) {
    %c0_i32 = arith.constant 0 : i32
    %c0_i32_0 = arith.constant 0 : i32
    %c0_i32_1 = arith.constant 0 : i32
    return %c0_i32, %c0_i32_0 : i32, i32
  }
  func.func @transform_7(%arg0: i32) -> (i32, i32) {
    %c0_i32 = arith.constant 0 : i32
    %c0_i32_0 = arith.constant 0 : i32
    %c0_i32_1 = arith.constant 0 : i32
    return %c0_i32, %c0_i32_0 : i32, i32
  }
  func.func @transform_8(%arg0: i32) -> (i32, i32) {
    %c0_i32 = arith.constant 0 : i32
    %c0_i32_0 = arith.constant 0 : i32
    %c0_i32_1 = arith.constant 0 : i32
    return %c0_i32, %c0_i32_0 : i32, i32
  }
  func.func @transform_9(%arg0: i32) -> (i32, i32) {
    %c0_i32 = arith.constant 0 : i32
    %c0_i32_0 = arith.constant 0 : i32
    %c0_i32_1 = arith.constant 0 : i32
    return %c0_i32, %c0_i32_0 : i32, i32
  }
  func.func @transform_10(%arg0: i32) -> (i32, i32) {
    %c0_i32 = arith.constant 0 : i32
    %c0_i32_0 = arith.constant 0 : i32
    %c0_i32_1 = arith.constant 0 : i32
    return %c0_i32, %c0_i32_0 : i32, i32
  }
  func.func @transform_11(%arg0: i32) -> (i32, i32) {
    %c0_i32 = arith.constant 0 : i32
    %c0_i32_0 = arith.constant 0 : i32
    %c0_i32_1 = arith.constant 0 : i32
    return %c0_i32, %c0_i32_0 : i32, i32
  }
  func.func @transform_12(%arg0: i32) -> (i32, i32) {
    %c0_i32 = arith.constant 0 : i32
    %c0_i32_0 = arith.constant 0 : i32
    %c0_i32_1 = arith.constant 0 : i32
    return %c0_i32, %c0_i32_0 : i32, i32
  }
  func.func @transform_13(%arg0: i32) -> (i32, i32) {
    %c0_i32 = arith.constant 0 : i32
    %c0_i32_0 = arith.constant 0 : i32
    return %arg0, %c0_i32 : i32, i32
  }
}

</mosaic_0001>

<bundles_post_ra>
// kernel: tpu_custom_call.1
= control target key start
LH: loop header
LB: loop body
LE: loop exit
PB: predicated region body
PF: predicated region fallthrough
CT: control target
= control target key end

     0   :  { %18 = vsyncpa [#allocation3], 0  ;;  %s3376_s0 = inlined_call_operand.hbm [shape: f32[32,128], index: 0, kind: input, shape index: {}]   ;;  %s3377_s1 = inlined_call_operand.hbm [shape: f32[4,128], index: 1, kind: input, shape index: {}]   ;;  %s3378_s2 = inlined_call_operand.hbm [shape: f32[1,128], index: 2, kind: input, shape index: {}]   ;;  %s3379_s3 = inlined_call_operand.hbm [shape: f32[1,128], index: 3, kind: input, shape index: {}]   ;;  %s3380_s4 = inlined_call_operand.hbm [shape: bf16[384,256], index: 4, kind: input, shape index: {}]   ;;  %s3381_s5 = inlined_call_operand.vmem [shape: f32[1,256], index: 5, kind: input, shape index: {}]   ;;  %s3382_s6 = inlined_call_operand.vmem [shape: f32[4,256], index: 6, kind: input, shape index: {}]   ;;  %s3383_s7 = inlined_call_operand.vmem [shape: f32[1,256], index: 7, kind: input, shape index: {}]   ;;  %s3384_s8 = inlined_call_operand.vmem [shape: f32[1,256], index: 8, kind: input, shape index: {}]   ;;  %s3385_s9 = inlined_call_operand.hbm [shape: bf16[768,256], index: 9, kind: input, shape index: {}]   ;;  %s3386_s10 = inlined_call_operand.vmem [shape: f32[1,256], index: 10, kind: input, shape index: {}]   ;;  %s3387_s11 = inlined_call_operand.hbm [shape: bf16[128,256], index: 11, kind: input, shape index: {}]   ;;  %s3388_s12 = inlined_call_operand.vmem [shape: f32[1,256], index: 12, kind: input, shape index: {}]   ;;  %s3389_s13 = inlined_call_operand.hbm [shape: f32[32,256], index: 13, kind: output, shape index: {}]  }
   0x1   :  { %19 = vsyncpa [#allocation6], 0 }
   0x2   :  { %20 = vsyncpa [#allocation9], 0 }
   0x3   :  { %21 = vsyncpa [#allocation12], 0 }
   0x4   :  { %22 = vsyncpa [#allocation4], 0  ;;  %s2881_s25 = smov [#allocation5]   ;;  %s2882_s27 = smov [#allocation8]  }
   0x5   :  { %s41_s26 = sshll.u32 %s2881_s25, 4  ;;  %s61_s28 = sshll.u32 %s2882_s27, 4  ;;  %s42_s26 = int_to_ptr.vmem [resolvable:$true] %s41_s26  ;;  %s62_s28 = int_to_ptr.vmem [resolvable:$true] %s61_s28 }
   0x6   :  { %s2719_s29 = scalar_lea.vmem %s42_s26, 64  ;;  %p2724_p1 = scmp.lt.s32.totalorder %s42_s26, %s42_s26 }
   0x7   :  { %p2720_p0 = scmp.ne.s32.totalorder %s42_s26, %s2719_s29  ;;  %p2725_p2 = scmp.lt.s32.totalorder %s2719_s29, %s2719_s29 }
   0x9   :  { %p2726_p3 = por %p2725_p2, %p2724_p1 }
   0xb   :  { %p2727_p4 = pnand %p2726_p3, %p2720_p0 }
   0xd   :  { %2730 = shalt.err (!%p2727_p4)
}
   0xe   :  { %44 = dma.hbm_to_vmem [thread:$0]  %s3377_s1, 64, %s42_s26, [#allocation6]  }
   0xf   :  { %s2739_s15 = scalar_lea.vmem %s62_s28, 16  ;;  %s2743_s16 = scalar_lea.vmem %s62_s28, 32 }
  0x10   :  { %p2740_p5 = scmp.ne.s32.totalorder %s62_s28, %s2739_s15  ;;  %p2744_p6 = scmp.lt.s32.totalorder %s62_s28, %s62_s28 }
  0x11   :  { %p2745_p7 = scmp.lt.s32.totalorder %s2743_s16, %s2739_s15 }
  0x13   :  { %p2746_p8 = por %p2745_p7, %p2744_p6 }
  0x15   :  { %p2747_p9 = pnand %p2746_p8, %p2740_p5 }
  0x17   :  { %2750 = shalt.err (!%p2747_p9)
}
  0x18   :  { %64 = dma.hbm_to_vmem [thread:$0]  %s3379_s3, 16, %s62_s28, [#allocation9]  }
  0x19   :  { %s2883_s19 = smov [#allocation11]   ;;  %s2884_s21 = smov [#allocation2]  }
  0x1a   :  { %s90_s20 = sshll.u32 %s2883_s19, 4  ;;  %s28_s22 = sshll.u32 %s2884_s21, 4  ;;  %s91_s20 = int_to_ptr.vmem [resolvable:$true] %s90_s20  ;;  %s29_s22 = int_to_ptr.vmem [resolvable:$true] %s28_s22 }
  0x1b   :  { %s2759_s23 = scalar_lea.vmem %s91_s20, 12288  ;;  %p2764_p11 = scmp.lt.s32.totalorder %s91_s20, %s91_s20 }
  0x1c   :  { %p2760_p10 = scmp.ne.s32.totalorder %s91_s20, %s2759_s23  ;;  %p2765_p12 = scmp.lt.s32.totalorder %s2759_s23, %s2759_s23 }
  0x1e   :  { %p2766_p13 = por %p2765_p12, %p2764_p11 }
  0x20   :  { %p2767_p0 = pnand %p2766_p13, %p2760_p10 }
  0x22   :  { %2770 = shalt.err (!%p2767_p0)
}
  0x23   :  { %s2885_s1 = smov 128   ;;  %s2886_s24 = smov 8  }
  0x24   :  { %96 = dma.hbm_to_vmem [thread:$0]  %s3385_s9, 12288, %s91_s20, [#allocation12], %s2885_s1, %s2885_s1, %s2886_s24  }
  0x25   :  { %s2779_s26 = scalar_lea.vmem %s29_s22, 512  ;;  %p2784_p2 = scmp.lt.s32.totalorder %s29_s22, %s29_s22 }
  0x26   :  { %p2780_p1 = scmp.ne.s32.totalorder %s29_s22, %s2779_s26  ;;  %p2785_p3 = scmp.lt.s32.totalorder %s2779_s26, %s2779_s26 }
  0x28   :  { %p2786_p4 = por %p2785_p3, %p2784_p2 }
  0x2a   :  { %p2787_p5 = pnand %p2786_p4, %p2780_p1 }
  0x2c   :  { %2790 = shalt.err (!%p2787_p5)
}
  0x2d   :  { %34 = dma.hbm_to_vmem [thread:$0]  %s3376_s0, 512, %s29_s22, [#allocation3], %s2885_s1, %s2885_s1, %s2886_s24  }
  0x2e   :  { %s2887_s29 = smov [#allocation7]   ;;  %s2888_s14 = smov [#allocation10]  }
  0x2f   :  { %s51_s30 = sshll.u32 %s2887_s29, 4  ;;  %s70_s15 = sshll.u32 %s2888_s14, 4  ;;  %s52_s30 = int_to_ptr.vmem [resolvable:$true] %s51_s30  ;;  %s71_s15 = int_to_ptr.vmem [resolvable:$true] %s70_s15 }
  0x30   :  { %s2799_s9 = scalar_lea.vmem %s52_s30, 16  ;;  %s2803_s16 = scalar_lea.vmem %s52_s30, 32 }
  0x31   :  { %p2800_p6 = scmp.ne.s32.totalorder %s52_s30, %s2799_s9  ;;  %p2804_p7 = scmp.lt.s32.totalorder %s52_s30, %s52_s30 }
  0x32   :  { %p2805_p8 = scmp.lt.s32.totalorder %s2803_s16, %s2799_s9 }
  0x34   :  { %p2806_p9 = por %p2805_p8, %p2804_p7 }
  0x36   :  { %p2807_p10 = pnand %p2806_p9, %p2800_p6 }
  0x38   :  { %2810 = shalt.err (!%p2807_p10)
}
  0x39   :  { %54 = dma.hbm_to_vmem [thread:$0]  %s3378_s2, 16, %s52_s30, [#allocation6]  }
  0x3a   :  { %s2819_s19 = scalar_lea.vmem %s71_s15, 6144  ;;  %p2824_p12 = scmp.lt.s32.totalorder %s71_s15, %s71_s15 }
  0x3b   :  { %p2820_p11 = scmp.ne.s32.totalorder %s71_s15, %s2819_s19  ;;  %p2825_p13 = scmp.lt.s32.totalorder %s2819_s19, %s2819_s19 }
  0x3d   :  { %p2826_p0 = por %p2825_p13, %p2824_p12 }
  0x3f   :  { %p2827_p1 = pnand %p2826_p0, %p2820_p11 }
  0x41   :  { %2830 = shalt.err (!%p2827_p1)
}
  0x42   :  { %76 = dma.hbm_to_vmem [thread:$0]  %s3380_s4, 6144, %s71_s15, [#allocation9], %s2885_s1, %s2885_s1, %s2886_s24  }
  0x43   :  { %s2889_s21 = smov [#allocation13]  }
  0x44   :  { %s104_s22 = sshll.u32 %s2889_s21, 4  ;;  %s105_s22 = int_to_ptr.vmem [resolvable:$true] %s104_s22 }
  0x45   :  { %s2839_s23 = scalar_lea.vmem %s105_s22, 2048  ;;  %p2844_p3 = scmp.lt.s32.totalorder %s105_s22, %s105_s22 }
  0x46   :  { %p2840_p2 = scmp.ne.s32.totalorder %s105_s22, %s2839_s23  ;;  %p2845_p4 = scmp.lt.s32.totalorder %s2839_s23, %s2839_s23 }
  0x48   :  { %p2846_p5 = por %p2845_p4, %p2844_p3 }
  0x4a   :  { %p2847_p6 = pnand %p2846_p5, %p2840_p2 }
  0x4c   :  { %2850 = shalt.err (!%p2847_p6)
}
  0x4d   :  { %110 = dma.hbm_to_vmem [thread:$0]  %s3387_s11, 2048, %s105_s22, [#allocation12], %s2885_s1, %s2885_s1, %s2886_s24  }
  0x4e   :  { %2871 = dma.done.wait [#allocation3], 512  }
  0x4f   :  { %2872 = vsyncadd [#allocation3], 4294966784 }
  0x50   :  { %2873 = dma.done.wait [#allocation6], 80  }
  0x51   :  { %2874 = vsyncadd [#allocation6], 4294967216 }
  0x52   :  { %2875 = dma.done.wait [#allocation9], 6160  }
  0x53   :  { %2876 = vsyncadd [#allocation9], 4294961136 }
  0x54   :  { %2877 = dma.done.wait [#allocation12], 14336  }
  0x55   :  { %2878 = vsyncadd [#allocation12], 4294952960  ;;  %v2999_v0 = vld [vmem:[#allocation2 + $0x10] sm:$0xff]  ;;  %v3001_v1 = vld [vmem:[#allocation2 + $0x18] sm:$0xff]  ;;  %vm235_vm0 = vcmask 1043456   ;;  %vm317_vm1 = vcmask 1041409  }
  0x56   :  { %v208_v2 = vadd.f32 %v3001_v1, %v2999_v0  ;;  %v217_v3 = vmul.f32 %v2999_v0, %v2999_v0  ;;  %v218_v4 = vmul.f32 %v3001_v1, %v3001_v1  ;;  %v3009_v5 = vld [vmem:[#allocation2] sm:$0xff]  ;;  %v3011_v6 = vld [vmem:[#allocation2 + $0x8] sm:$0xff]  ;;  %vm2892_vm6 = vmmov 1  }
  0x57   :  { %v201_v7 = vadd.f32 %v3011_v6, %v3009_v5  ;;  %v215_v8 = vmul.f32 %v3009_v5, %v3009_v5  ;;  %v216_v9 = vmul.f32 %v3011_v6, %v3011_v6  ;;  %v3019_v24 = vld [vmem:[#allocation5] sm:$0xf]  ;;  %v2410_v45 = vld [vmem:[#allocation10 + $0x74] ss:$8 sps:$4 sm:$0xff]   ;;  %v2413_v47 = vld [vmem:[#allocation10 + $0x64] ss:$8 sps:$4 sm:$0xff]  }
  0x58   :  { %v209_v10 = vrot.slane %v208_v2, 4  ;;  %v226_v11 = vadd.f32 %v218_v4, %v217_v3  ;;  %v2412_v46 = vld [vmem:[#allocation10 + $0x70] ss:$8 sps:$4 sm:$0xff]   ;;  %742 = vmatprep.subr.bf16.mxu0 %v2410_v45  ;;  %v2415_v48 = vld [vmem:[#allocation10 + $0x60] ss:$8 sps:$4 sm:$0xff]  }
  0x59   :  { %v202_v12 = vrot.slane %v201_v7, 4  ;;  %v219_v13 = vadd.f32 %v216_v9, %v215_v8  ;;  %743 = vmatpush1.bf16.msra.mxu0 %v2412_v46  ;;  %v2416_v49 = vld [vmem:[#allocation10 + $0x54] ss:$8 sps:$4 sm:$0xff]   ;;  %v2439_v51 = vld [vmem:[#allocation10 + $0x170] ss:$8 sps:$4 sm:$0xff]  }
  0x5a   :  { %v210_v14 = vadd.f32 %v209_v10, %v208_v2  ;;  %v227_v15 = vrot.slane %v226_v11, 4  ;;  %744 = vmatprep.subr.bf16.mxu0 %v2413_v47  ;;  %v2436_v50 = vld [vmem:[#allocation10 + $0x174] ss:$8 sps:$4 sm:$0xff]   ;;  %v2418_v52 = vld [vmem:[#allocation10 + $0x50] ss:$8 sps:$4 sm:$0xff]  }
  0x5b   :  { %v203_v16 = vadd.f32 %v202_v12, %v201_v7  ;;  %v220_v17 = vrot.slane %v219_v13, 4  ;;  %795 = vmatprep.subr.bf16.mxu1 %v2436_v50  ;;  %v2442_v53 = vld [vmem:[#allocation10 + $0x164] ss:$8 sps:$4 sm:$0xff]   ;;  %v2445_v55 = vld [vmem:[#allocation10 + $0x160] ss:$8 sps:$4 sm:$0xff]  }
  0x5c   :  { %v211_v18 = vrot.slane %v210_v14, 2  ;;  %v228_v19 = vadd.f32 %v227_v15, %v226_v11  ;;  %v2419_v54 = vld [vmem:[#allocation10 + $0x44] ss:$8 sps:$4 sm:$0xff]   ;;  %796 = vmatpush1.bf16.msra.mxu1 %v2439_v51  ;;  %v2448_v56 = vld [vmem:[#allocation10 + $0x154] ss:$8 sps:$4 sm:$0xff]  }
  0x5d   :  { %v204_v20 = vrot.slane %v203_v16, 2  ;;  %v221_v21 = vadd.f32 %v220_v17, %v219_v13  ;;  %745 = vmatpush1.bf16.msra.mxu0 %v2415_v48  ;;  %797 = vmatprep.subr.bf16.mxu1 %v2442_v53  ;;  %v2421_v57 = vld [vmem:[#allocation10 + $0x40] ss:$8 sps:$4 sm:$0xff]   ;;  %v2422_v58 = vld [vmem:[#allocation10 + $0x34] ss:$8 sps:$4 sm:$0xff]  }
  0x5e   :  { %v212_v22 = vadd.f32 %v211_v18, %v210_v14  ;;  %v229_v23 = vrot.slane %v228_v19, 2  ;;  %746 = vmatprep.subr.bf16.mxu0 %v2416_v49  ;;  %v2451_v59 = vld [vmem:[#allocation10 + $0x150] ss:$8 sps:$4 sm:$0xff]   ;;  %v2454_v60 = vld [vmem:[#allocation10 + $0x144] ss:$8 sps:$4 sm:$0xff]  }
  0x5f   :  { %v205_v25 = vadd.f32 %v204_v20, %v203_v16  ;;  %v222_v26 = vrot.slane %v221_v21, 2  ;;  %v2424_v61 = vld [vmem:[#allocation10 + $0x30] ss:$8 sps:$4 sm:$0xff]   ;;  %v2425_v62 = vld [vmem:[#allocation10 + $0x24] ss:$8 sps:$4 sm:$0xff]  }
  0x60   :  { %v213_v27 = vrot.slane %v212_v22, 1  ;;  %v230_v28 = vadd.f32 %v229_v23, %v228_v19  ;;  %798 = vmatpush1.bf16.msra.mxu1 %v2445_v55  ;;  %v2457_v63 = vld [vmem:[#allocation10 + $0x140] ss:$8 sps:$4 sm:$0xff]   ;;  %v2460_v2 = vld [vmem:[#allocation10 + $0x134] ss:$8 sps:$4 sm:$0xff]  }
  0x61   :  { %v206_v29 = vrot.slane %v205_v25, 1  ;;  %v223_v30 = vadd.f32 %v222_v26, %v221_v21  ;;  %747 = vmatpush1.bf16.msra.mxu0 %v2418_v52  ;;  %799 = vmatprep.subr.bf16.mxu1 %v2448_v56  ;;  %v2427_v3 = vld [vmem:[#allocation10 + $0x20] ss:$8 sps:$4 sm:$0xff]   ;;  %v2428_v4 = vld [vmem:[#allocation10 + $0x14] ss:$8 sps:$4 sm:$0xff]  }
  0x62   :  { %v214_v31 = vadd.f32 %v213_v27, %v212_v22  ;;  %v231_v32 = vrot.slane %v230_v28, 1  ;;  %748 = vmatprep.subr.bf16.mxu0 %v2419_v54  ;;  %v2463_v7 = vld [vmem:[#allocation10 + $0x130] ss:$8 sps:$4 sm:$0xff]   ;;  %v2466_v8 = vld [vmem:[#allocation10 + $0x124] ss:$8 sps:$4 sm:$0xff]  }
  0x63   :  { %v207_v33 = vadd.f32 %v206_v29, %v205_v25  ;;  %v224_v34 = vrot.slane %v223_v30, 1  ;;  %v2430_v9 = vld [vmem:[#allocation10 + $0x10] ss:$8 sps:$4 sm:$0xff]   ;;  %v2431_v10 = vld [vmem:[#allocation10 + $0x4] ss:$8 sps:$4 sm:$0xff]  }
  0x64   :  { %v234_v35 = vmul.f32 %v214_v31, %v3019_v24  ;;  %v232_v36 = vadd.f32 %v231_v32, %v230_v28  ;;  %800 = vmatpush1.bf16.msra.mxu1 %v2451_v59  ;;  %v2469_v11 = vld [vmem:[#allocation10 + $0x120] ss:$8 sps:$4 sm:$0xff]   ;;  %v2472_v12 = vld [vmem:[#allocation10 + $0x114] ss:$8 sps:$4 sm:$0xff]   ;;  %v2475_v15 = vld [vmem:[#allocation10 + $0x110] ss:$8 sps:$4 sm:$0xff]  }
  0x65   :  { %v233_v37 = vmul.f32 %v207_v33, %v3019_v24  ;;  %v225_v38 = vadd.f32 %v224_v34, %v223_v30  ;;  %749 = vmatpush1.bf16.msra.mxu0 %v2421_v57  ;;  %801 = vmatprep.subr.bf16.mxu1 %v2454_v60  ;;  %v2433_v13 = vld [vmem:[#allocation10] ss:$8 sps:$4 sm:$0xff]   ;;  %v2434_v14 = vld [vmem:[#allocation10 + $0xf4] ss:$8 sps:$4 sm:$0xff]   ;;  %v2438_v16 = vld [vmem:[#allocation10 + $0xf0] ss:$8 sps:$4 sm:$0xff]  }
  0x66   :  { %v239_v39 = vsel %vm235_vm0, %v234_v35, 0.0  ;;  %v245_v40 = vmul.f32 %v232_v36, %v3019_v24  ;;  %750 = vmatprep.subr.bf16.mxu0 %v2422_v58  ;;  %v2440_v17 = vld [vmem:[#allocation10 + $0xe4] ss:$8 sps:$4 sm:$0xff]   ;;  %v2444_v18 = vld [vmem:[#allocation10 + $0xe0] ss:$8 sps:$4 sm:$0xff]   ;;  %v2890_v34 = vmov 0  }
  0x67   :  { %240 = vadd.xlane.f32.xlu0 %v239_v39  ;;  %v244_v41 = vmul.f32 %v225_v38, %v3019_v24  ;;  %v236_v43 = vsel %vm235_vm0, %v233_v37, 0.0  ;;  %v2446_v19 = vld [vmem:[#allocation10 + $0xd4] ss:$8 sps:$4 sm:$0xff]   ;;  %v2450_v20 = vld [vmem:[#allocation10 + $0xd0] ss:$8 sps:$4 sm:$0xff]   ;;  %827 = vmatprep.mubr.bf16.mxu1 %v2890_v34 }
  0x68   :  { %v249_v42 = vsel %vm235_vm0, %v245_v40, 0.0  ;;  %802 = vmatpush1.bf16.msra.mxu1 %v2457_v63  ;;  %v2452_v21 = vld [vmem:[#allocation10 + $0xc4] ss:$8 sps:$4 sm:$0xff]   ;;  %v2456_v22 = vld [vmem:[#allocation10 + $0xc0] ss:$8 sps:$4 sm:$0xff]  }
  0x69   :  { %250 = vadd.xlane.f32.xlu1 %v249_v42  ;;  %v246_v44 = vsel %vm235_vm0, %v244_v41, 0.0  ;;  %751 = vmatpush1.bf16.msra.mxu0 %v2424_v61  ;;  %v2458_v23 = vld [vmem:[#allocation10 + $0xb4] ss:$8 sps:$4 sm:$0xff]   ;;  %v2462_v25 = vld [vmem:[#allocation10 + $0xb0] ss:$8 sps:$4 sm:$0xff]  }
  0x6a   :  { %752 = vmatprep.subr.bf16.mxu0 %v2425_v62  ;;  %803 = vmatprep.subr.bf16.mxu1 %v2460_v2  ;;  %v2464_v26 = vld [vmem:[#allocation10 + $0xa4] ss:$8 sps:$4 sm:$0xff]   ;;  %v2468_v27 = vld [vmem:[#allocation10 + $0xa0] ss:$8 sps:$4 sm:$0xff]   ;;  %v2470_v28 = vld [vmem:[#allocation10 + $0x94] ss:$8 sps:$4 sm:$0xff]  }
  0x6b   :  { %237 = vadd.xlane.f32.xlu0 %v236_v43  ;;  %v2474_v29 = vld [vmem:[#allocation10 + $0x90] ss:$8 sps:$4 sm:$0xff]   ;;  %v2476_v30 = vld [vmem:[#allocation10 + $0x84] ss:$8 sps:$4 sm:$0xff]   ;;  %v2480_v32 = vld [vmem:[#allocation10 + $0x80] ss:$8 sps:$4 sm:$0xff]  }
  0x6c   :  { %804 = vmatpush1.bf16.msra.mxu1 %v2463_v7  ;;  %v2478_v31 = vld [vmem:[#allocation10 + $0x104] ss:$8 sps:$4 sm:$0xff]   ;;  %v2481_v33 = vld [vmem:[#allocation10 + $0x100] ss:$8 sps:$4 sm:$0xff]  }
  0x6d   :  { %247 = vadd.xlane.f32.xlu1 %v246_v44  ;;  %753 = vmatpush1.bf16.msra.mxu0 %v2427_v3 }
  0x6e   :  { %754 = vmatprep.subr.bf16.mxu0 %v2428_v4  ;;  %805 = vmatprep.subr.bf16.mxu1 %v2466_v8 }
  0x70   :  { %806 = vmatpush1.bf16.msra.mxu1 %v2469_v11 }
  0x71   :  { %755 = vmatpush1.bf16.msra.mxu0 %v2430_v9  ;;  %807 = vmatprep.subr.bf16.mxu1 %v2472_v12 }
  0x72   :  { %756 = vmatprep.subr.bf16.mxu0 %v2431_v10 }
  0x74   :  { %808 = vmatpush1.bf16.msra.mxu1 %v2475_v15 }
  0x75   :  { %757 = vmatpush1.bf16.msra.mxu0 %v2433_v13  ;;  %809 = vmatprep.subr.bf16.mxu1 %v2478_v31 }
  0x76   :  { %758 = vmatprep.subr.bf16.mxu0 %v2434_v14 }
  0x78   :  { %810 = vmatpush1.bf16.msra.mxu1 %v2481_v33 }
  0x79   :  { %759 = vmatpush2.bf16.msra.mxu0 %v2438_v16 }
  0x7a   :  { %760 = vmatprep.subr.bf16.mxu0 %v2440_v17 }
  0x7d   :  { %761 = vmatpush2.bf16.msra.mxu0 %v2444_v18  ;;  %v2197_v18 = vld [vmem:[#allocation7] ss:$0 sm:$0xff] }
  0x7e   :  { %762 = vmatprep.subr.bf16.mxu0 %v2446_v19 }
  0x81   :  { %763 = vmatpush2.bf16.msra.mxu0 %v2450_v20 }
  0x82   :  { %764 = vmatprep.subr.bf16.mxu0 %v2452_v21  ;;  %v139_v21 = vlaneseq }
  0x85   :  { %765 = vmatpush2.bf16.msra.mxu0 %v2456_v22  ;;  %v2891_v22 = vmov 1966171168  }
  0x86   :  { %766 = vmatprep.subr.bf16.mxu0 %v2458_v23  ;;  %v335_v23 = vunpack.c.l.s4 %v2891_v22 }
  0x89   :  { %767 = vmatpush2.bf16.msra.mxu0 %v2462_v25 }
  0x8a   :  { %768 = vmatprep.subr.bf16.mxu0 %v2464_v26 }
  0x8d   :  { %769 = vmatpush2.bf16.msra.mxu0 %v2468_v27 }
  0x8e   :  { %770 = vmatprep.subr.bf16.mxu0 %v2470_v28 }
  0x91   :  { %771 = vmatpush2.bf16.msra.mxu0 %v2474_v29 }
  0x92   :  { %772 = vmatprep.subr.bf16.mxu0 %v2476_v30  ;;  %v336_v30 = vunpack.c.0.s8 %v335_v23 }
  0x95   :  { %773 = vmatpush2.bf16.msra.mxu0 %v2480_v32  ;;  %v3038_v32 = vshrl.u32 %v139_v21, 7 }
  0x97   :  { %vm398_vm3 = vcmp.lt.s32.totalorder %v3038_v32, 1  ;;  %v142_v23 = vadd.s32 16, %v3038_v32  ;;  %vm419_vm5 = vcmp.lt.s32.totalorder %v3038_v32, 7 }
  0xf0   :  { %v241_v35 = vpop.xlane.xlu0 %240 }
  0xf1   :  { %v243_v36 = vmul.f32 0.001953125, %v241_v35  ;;  %v2198_v35 = vld [vmem:[#allocation8] ss:$0 sm:$0xff] }
  0xf2   :  { %v251_v37 = vpop.xlane.xlu1 %250 }
  0xf3   :  { %v255_v38 = vmul.f32 %v243_v36, %v243_v36  ;;  %v253_v39 = vmul.f32 0.001953125, %v251_v37  ;;  %v265_v50 = vmul.f32 %v243_v36, %v3019_v24 }
  0xf4   :  { %v238_v40 = vpop.xlane.xlu0 %237 }
  0xf5   :  { %v257_v41 = vsub.f32 %v253_v39, %v255_v38  ;;  %v242_v42 = vmul.f32 0.001953125, %v238_v40  ;;  %v273_v52 = vsel %vm235_vm0, %v265_v50, 0.0  ;;  %v3041_v38 = vsub.s32 %v336_v30, %v3038_v32 }
  0xf6   :  { %v248_v43 = vpop.xlane.xlu1 %247  ;;  %v274_v54 = vrot.slane %v273_v52, 4  ;;  %v3045_v40 = vsub.s32 0, %v3038_v32 }
  0xf7   :  { %v259_v44 = vmax.f32 %v257_v41, 0.0  ;;  %v254_v45 = vmul.f32 %v242_v42, %v242_v42  ;;  %v252_v46 = vmul.f32 0.001953125, %v248_v43  ;;  %v264_v53 = vmul.f32 %v242_v42, %v3019_v24 }
  0xf8   :  { %v275_v57 = vadd.f32 %v274_v54, %v273_v52 }
  0xf9   :  { %v261_v47 = vadd.f32 1e-05, %v259_v44  ;;  %v256_v48 = vsub.f32 %v252_v46, %v254_v45  ;;  %v266_v55 = vsel %vm235_vm0, %v264_v53, 0.0 }
  0xfa   :  { %v267_v58 = vrot.slane %v266_v55, 4  ;;  %v276_v62 = vrot.slane %v275_v57, 2 }
  0xfb   :  { %2651 = vrsqrt.f32 %v261_v47  ;;  %v258_v49 = vmax.f32 %v256_v48, 0.0 }
  0xfc   :  { %v268_v2 = vadd.f32 %v267_v58, %v266_v55  ;;  %v277_v8 = vadd.f32 %v276_v62, %v275_v57 }
  0xfd   :  { %v260_v51 = vadd.f32 1e-05, %v258_v49 }
  0xfe   :  { %v269_v9 = vrot.slane %v268_v2, 2  ;;  %v278_v14 = vrot.slane %v277_v8, 1 }
  0xff   :  { %2653 = vrsqrt.f32 %v260_v51 }
 0x100   :  { %v270_v15 = vadd.f32 %v269_v9, %v268_v2 }
 0x102   :  { %v271_v25 = vrot.slane %v270_v15, 1 }
 0x104   :  { %v272_v31 = vadd.f32 %v271_v25, %v270_v15 }
 0x108   :  { %v2652_v56 = vpop.eup %2651 }
 0x109   :  { %v281_v59 = vmul.f32 %v2652_v56, %v3019_v24 }
 0x10b   :  { %v289_v60 = vsel %vm235_vm0, %v281_v59, 0.0 }
 0x10c   :  { %v2654_v61 = vpop.eup %2653  ;;  %v290_v63 = vrot.slane %v289_v60, 4 }
 0x10d   :  { %v280_v3 = vmul.f32 %v2654_v61, %v3019_v24  ;;  %v279_v24 = vadd.f32 %v278_v14, %v277_v8 }
 0x10e   :  { %v291_v4 = vadd.f32 %v290_v63, %v289_v60 }
 0x10f   :  { %v282_v7 = vsel %vm235_vm0, %v280_v3, 0.0 }
 0x110   :  { %v283_v10 = vrot.slane %v282_v7, 4  ;;  %v292_v11 = vrot.slane %v291_v4, 2 }
 0x112   :  { %v284_v12 = vadd.f32 %v283_v10, %v282_v7  ;;  %v293_v13 = vadd.f32 %v292_v11, %v291_v4  ;;  %v141_v10 = vadd.s32 8, %v3038_v32  ;;  %v148_v11 = vand.u32 15, %v3038_v32 }
 0x114   :  { %v285_v16 = vrot.slane %v284_v12, 2  ;;  %v294_v17 = vrot.slane %v293_v13, 1  ;;  %v155_v15 = vand.u32 15, %v141_v10  ;;  %vm3060_vm2 = vcmp.ne.s32.totalorder %v148_v11, 0 }
 0x115   :  { %vm3075_vm7 = vmpackc.low %vm2892_vm6, %vm3060_vm2 }
 0x116   :  { %v286_v19 = vadd.f32 %v285_v16, %v284_v12  ;;  %v295_v20 = vadd.f32 %v294_v17, %v293_v13  ;;  %vm197_vm4 = vcmp.ne.s32.totalorder %v155_v15, 15 }
 0x117   :  { %vm3084_vm8 = vmpackc.low %vm197_vm4, %vm2892_vm6 }
 0x118   :  { %v287_v26 = vrot.slane %v286_v19, 1  ;;  %v304_v27 = vmul.f32 %v2197_v18, %v295_v20 }
 0x11a   :  { %v288_v28 = vadd.f32 %v287_v26, %v286_v19  ;;  %v307_v29 = vmul.f32 %v304_v27, %v279_v24  ;;  %v328_v44 = vrot.slane %v304_v27, %v3045_v40 }
 0x11c   :  { %v303_v33 = vmul.f32 %v2197_v18, %v288_v28  ;;  %v316_v37 = vrot.slane %v307_v29, 7  ;;  %v331_v51 = vmul.f32 %v328_v44, %v2999_v0  ;;  %v332_v52 = vmul.f32 %v328_v44, %v3001_v1 }
 0x11d   :  { %v143_v29 = vadd.s32 24, %v3038_v32 }
 0x11e   :  { %v306_v36 = vmul.f32 %v303_v33, %v272_v31  ;;  %v324_v42 = vrot.slane %v303_v33, %v3045_v40 }
 0x120   :  { %v318_v39 = vsel %vm317_vm1, %v316_v37, %v306_v36  ;;  %v329_v47 = vmul.f32 %v324_v42, %v3009_v5  ;;  %v330_v48 = vmul.f32 %v324_v42, %v3011_v6  ;;  %v162_v42 = vand.u32 15, %v142_v23 }
 0x121   :  { %v320_v41 = vsub.f32 %v2198_v35, %v318_v39 }
 0x122   :  { %vm194_vm9 = vcmp.ne.s32.totalorder %v162_v42, 0 }
 0x123   :  { %v340_v43 = vrot.slane %v320_v41, %v3041_v38  ;;  %vm3102_vm11 = vmpackc.low %vm2892_vm6, %vm194_vm9 }
 0x125   :  { %v341_v45 = vcombine.high %v340_v43, %v340_v43  ;;  %v348_v46 = vrot.slane %v340_v43, %v3041_v38 }
 0x127   :  { %v355_v49 = vrot.slane %v341_v45, %v3041_v38  ;;  %v359_v50 = vrot.slane %v348_v46, %v3045_v40  ;;  %v169_v46 = vand.u32 15, %v143_v29 }
 0x129   :  { %v363_v53 = vrot.slane %v355_v49, %v3045_v40  ;;  %v366_v54 = vadd.f32 %v359_v50, %v329_v47  ;;  %v367_v55 = vadd.f32 %v359_v50, %v330_v48  ;;  %vm199_vm10 = vcmp.ne.s32.totalorder %v169_v46, 15 }
 0x12a   :  { %vm3107_vm12 = vmpackc.low %vm199_vm10, %vm2892_vm6 }
 0x12b   :  { %v370_v56 = vsub.f32 0.0, %v366_v54  ;;  %v371_v57 = vsub.f32 0.0, %v367_v55  ;;  %v369_v58 = vadd.f32 %v363_v53, %v332_v52  ;;  %v368_v59 = vadd.f32 %v363_v53, %v331_v51  ;;  %v2636_v52 = vld [vmem:[#allocation13 + $0x10] ss:$8 sps:$4 sm:$0xff]  }
 0x12d   :  { %v374_v60 = vmul.f32 1.442695, %v370_v56  ;;  %v376_v5 = vmul.f32 1.442695, %v371_v57  ;;  %v373_v61 = vsub.f32 0.0, %v369_v58  ;;  %v372_v6 = vsub.f32 0.0, %v368_v59 }
 0x12e   :  { %v490_v56 = vld [vmem:[%s3381_s5] sm:$0x3]  ;;  %v3119_v57 = vsub.s32 1, %v3038_v32 }
 0x12f   :  { %2655 = vpow2.f32 %v374_v60  ;;  %v380_v62 = vmul.f32 1.442695, %v373_v61  ;;  %v378_v63 = vmul.f32 1.442695, %v372_v6 }
 0x130   :  { %2657 = vpow2.f32 %v376_v5 }
 0x131   :  { %2659 = vpow2.f32 %v380_v62 }
 0x132   :  { %2661 = vpow2.f32 %v378_v63 }
 0x13c   :  { %v2656_v0 = vpop.eup %2655 }
 0x13d   :  { %v2658_v1 = vpop.eup %2657  ;;  %v382_v2 = vadd.f32 1.0, %v2656_v0 }
 0x13e   :  { %v2660_v3 = vpop.eup %2659  ;;  %v383_v4 = vadd.f32 1.0, %v2658_v1 }
 0x13f   :  { %v2662_v7 = vpop.eup %2661  ;;  %2663 = vrcp.f32 %v382_v2  ;;  %v385_v8 = vadd.f32 1.0, %v2660_v3 }
 0x140   :  { %2665 = vrcp.f32 %v383_v4  ;;  %v384_v9 = vadd.f32 1.0, %v2662_v7 }
 0x141   :  { %2667 = vrcp.f32 %v385_v8 }
 0x142   :  { %2669 = vrcp.f32 %v384_v9 }
 0x14c   :  { %v2664_v12 = vpop.eup %2663 }
 0x14d   :  { %v2666_v13 = vpop.eup %2665  ;;  %v390_v14 = vmul.f32 %v2664_v12, %v366_v54  ;;  %v1347_v54 = vld [vmem:[%s3386_s10] sm:$0x3]  ;;  %s2893_s10 = smov [#allocation14]  }
 0x14e   :  { %v2668_v16 = vpop.eup %2667  ;;  %v391_v17 = vmul.f32 %v2666_v13, %v367_v55 }
 0x14f   :  { %v2670_v19 = vpop.eup %2669  ;;  %v394_v20 = vrot.slane %v390_v14, 7  ;;  %v415_v21 = vrot.slane %v390_v14, 1  ;;  %v393_v22 = vmul.f32 %v2668_v16, %v369_v58  ;;  %v495_v58 = vrot.slane %v490_v56, %v3045_v40 }
 0x150   :  { %v395_v24 = vrot.slane %v391_v17, 7  ;;  %v416_v25 = vrot.slane %v391_v17, 1  ;;  %v437_v26 = vpack.c.bf16 %v391_v17, %v390_v14  ;;  %v392_v27 = vmul.f32 %v2670_v19, %v368_v59 }
 0x151   :  { %v397_v28 = vrot.slane %v393_v22, 7  ;;  %v418_v47 = vrot.slane %v393_v22, 1  ;;  %v499_v59 = vrot.slane %v490_v56, %v3119_v57 }
 0x152   :  { %774 = vmatprep.mubr.bf16.mxu0 %v437_v26  ;;  %v417_v30 = vrot.slane %v392_v27, 1  ;;  %v401_v31 = vsel %vm398_vm3, %v394_v20, %v395_v24  ;;  %v422_v39 = vsel %vm419_vm5, %v415_v21, %v416_v25  ;;  %v440_v44 = vpack.c.bf16 %v393_v22, %v392_v27 }
 0x153   :  { %v402_v33 = vsel %vm398_vm3, %v397_v28, %v394_v20  ;;  %v396_v45 = vrot.slane %v392_v27, 7  ;;  %v423_v51 = vsel %vm419_vm5, %v418_v47, %v415_v21 }
 0x154   :  { %v2248_v36 = vpack.c.bf16 %v401_v31, %v402_v33  ;;  %v421_v37 = vsel %vm419_vm5, %v416_v25, %v417_v30  ;;  %v420_v50 = vsel %vm419_vm5, %v417_v30, %v418_v47 }
 0x155   :  { %v2254_v43 = vpack.c.bf16 %v421_v37, %v422_v39  ;;  %v399_v48 = vsel %vm398_vm3, %v396_v45, %v397_v28  ;;  %v400_v49 = vsel %vm398_vm3, %v395_v24, %v396_v45  ;;  %v2257_v55 = vpack.c.bf16 %v423_v51, %v420_v50 }
 0x156   :  { %2249 = vmatmul.mubr.msk.bf16.vlgmr.msra.gmra.mxu0 %vm3075_vm7, %v2248_v36  ;;  %v2251_v53 = vpack.c.bf16 %v399_v48, %v400_v49  ;;  %v3148_v36 = vld [vmem:[%s3382_s6] sm:$0xff] }
 0x157   :  { %2255 = vmatmul.mubr.msk.bf16.vlgmr.msra.gmra.mxu1 %vm3084_vm8, %v2254_v43  ;;  %784 = vmatprep.mubr.bf16.mxu0 %v440_v44  ;;  %v3158_v50 = vcombine.high %v3148_v36, %v3148_v36 }
 0x158   :  { %837 = vmatprep.mubr.bf16.mxu1 %v2890_v34 }
 0x15e   :  { %2252 = vmatmul.mubr.msk.bf16.gmra.mxu0 %vm3102_vm11, %v2251_v53 }
 0x15f   :  { %2258 = vmatmul.mubr.msk.bf16.gmra.mxu1 %vm3107_vm12, %v2257_v55 }
 0x216   :  { %v776_v60 = vpop.f32.mrf.mxu0 }
 0x217   :  { %v777_v5 = vadd.f32 %v776_v60, %v495_v58  ;;  %v829_v61 = vpop.f32.mrf.mxu1 }
 0x218   :  { %v778_v6 = vpop.f32.mrf.mxu0 }
 0x219   :  { %v779_v62 = vadd.f32 %v778_v6, %v499_v59  ;;  %v831_v63 = vpop.f32.mrf.mxu1  ;;  %v3123_v0 = vadd.f32 %v829_v61, %v777_v5 }
 0x21a   :  { %v780_v1 = vpop.f32.mrf.mxu0 }
 0x21b   :  { %v781_v2 = vadd.f32 %v780_v1, %v495_v58  ;;  %v833_v3 = vpop.f32.mrf.mxu1  ;;  %v3125_v4 = vadd.f32 %v831_v63, %v779_v62  ;;  %v877_v11 = vmul.f32 %v3123_v0, %v3123_v0 }
 0x21c   :  { %v782_v7 = vpop.f32.mrf.mxu0 }
 0x21d   :  { %v3127_v8 = vadd.f32 %v833_v3, %v781_v2  ;;  %v783_v9 = vadd.f32 %v782_v7, %v499_v59  ;;  %v835_v10 = vpop.f32.mrf.mxu1  ;;  %v878_v18 = vmul.f32 %v3125_v4, %v3125_v4 }
 0x21e   :  { %v786_v12 = vpop.f32.mrf.mxu0 }
 0x21f   :  { %v849_v13 = vadd.f32 %v3127_v8, %v3123_v0  ;;  %v879_v14 = vmul.f32 %v3127_v8, %v3127_v8  ;;  %v3135_v15 = vadd.f32 %v835_v10, %v783_v9  ;;  %v787_v16 = vadd.f32 %v786_v12, %v495_v58  ;;  %v839_v17 = vpop.f32.mrf.mxu1 }
 0x220   :  { %v788_v19 = vpop.f32.mrf.mxu0 }
 0x221   :  { %v850_v20 = vrot.slane %v849_v13, 4  ;;  %v885_v21 = vadd.f32 %v879_v14, %v877_v11  ;;  %v856_v22 = vadd.f32 %v3135_v15, %v3125_v4  ;;  %v880_v23 = vmul.f32 %v3135_v15, %v3135_v15  ;;  %v841_v24 = vpop.f32.mrf.mxu1 }
 0x222   :  { %v3143_v25 = vadd.f32 %v839_v17, %v787_v16  ;;  %v789_v26 = vadd.f32 %v788_v19, %v499_v59  ;;  %v790_v27 = vpop.f32.mrf.mxu0 }
 0x223   :  { %v851_v28 = vadd.f32 %v850_v20, %v849_v13  ;;  %v886_v29 = vrot.slane %v885_v21, 4  ;;  %v857_v30 = vrot.slane %v856_v22, 4  ;;  %v892_v31 = vadd.f32 %v880_v23, %v878_v18  ;;  %v843_v33 = vpop.f32.mrf.mxu1 }
 0x224   :  { %v3150_v37 = vadd.f32 %v841_v24, %v789_v26  ;;  %v791_v39 = vadd.f32 %v790_v27, %v495_v58  ;;  %v792_v42 = vpop.f32.mrf.mxu0  ;;  %v881_v47 = vmul.f32 %v3143_v25, %v3143_v25 }
 0x225   :  { %v852_v43 = vrot.slane %v851_v28, 2  ;;  %v887_v44 = vadd.f32 %v886_v29, %v885_v21  ;;  %v858_v45 = vadd.f32 %v857_v30, %v856_v22  ;;  %v893_v46 = vrot.slane %v892_v31, 4  ;;  %v845_v55 = vpop.f32.mrf.mxu1 }
 0x226   :  { %v3154_v48 = vadd.f32 %v843_v33, %v791_v39  ;;  %v793_v49 = vadd.f32 %v792_v42, %v499_v59  ;;  %v882_v60 = vmul.f32 %v3150_v37, %v3150_v37 }
 0x227   :  { %v859_v51 = vrot.slane %v858_v45, 2  ;;  %v894_v53 = vadd.f32 %v893_v46, %v892_v31  ;;  %v853_v56 = vadd.f32 %v852_v43, %v851_v28  ;;  %v888_v58 = vrot.slane %v887_v44, 2 }
 0x228   :  { %v863_v5 = vadd.f32 %v3154_v48, %v3143_v25  ;;  %v883_v61 = vmul.f32 %v3154_v48, %v3154_v48  ;;  %v3166_v6 = vadd.f32 %v845_v55, %v793_v49 }
 0x229   :  { %v854_v59 = vrot.slane %v853_v56, 1  ;;  %v860_v62 = vadd.f32 %v859_v51, %v858_v45  ;;  %v889_v63 = vadd.f32 %v888_v58, %v887_v44  ;;  %v895_v1 = vrot.slane %v894_v53, 2 }
 0x22a   :  { %v864_v2 = vrot.slane %v863_v5, 4  ;;  %v899_v3 = vadd.f32 %v883_v61, %v881_v47  ;;  %v870_v7 = vadd.f32 %v3166_v6, %v3150_v37  ;;  %v884_v9 = vmul.f32 %v3166_v6, %v3166_v6 }
 0x22b   :  { %v855_v10 = vadd.f32 %v854_v59, %v853_v56  ;;  %v861_v11 = vrot.slane %v860_v62, 1  ;;  %v890_v12 = vrot.slane %v889_v63, 1  ;;  %v896_v13 = vadd.f32 %v895_v1, %v894_v53 }
 0x22c   :  { %v865_v14 = vadd.f32 %v864_v2, %v863_v5  ;;  %v900_v16 = vrot.slane %v899_v3, 4  ;;  %v871_v17 = vrot.slane %v870_v7, 4  ;;  %v906_v18 = vadd.f32 %v884_v9, %v882_v60 }
 0x22d   :  { %v862_v19 = vadd.f32 %v861_v11, %v860_v62  ;;  %v916_v20 = vmul.f32 %v855_v10, %v3148_v36  ;;  %v891_v21 = vadd.f32 %v890_v12, %v889_v63  ;;  %v897_v22 = vrot.slane %v896_v13, 1 }
 0x22e   :  { %v866_v23 = vrot.slane %v865_v14, 2  ;;  %v901_v24 = vadd.f32 %v900_v16, %v899_v3  ;;  %v872_v26 = vadd.f32 %v871_v17, %v870_v7  ;;  %v907_v27 = vrot.slane %v906_v18, 4 }
 0x22f   :  { %v917_v28 = vmul.f32 %v3158_v50, %v862_v19  ;;  %v898_v29 = vadd.f32 %v897_v22, %v896_v13  ;;  %v920_v42 = vsel %vm235_vm0, %v916_v20, 0.0  ;;  %v932_v44 = vmul.f32 %v891_v21, %v3148_v36  ;;  %v2483_v19 = vld [vmem:[#allocation11 + $0x170] ss:$8 sps:$4 sm:$0xff]   ;;  %v2488_v20 = vld [vmem:[#allocation11 + $0x74] ss:$8 sps:$4 sm:$0xff]  }
 0x230   :  { %v873_v30 = vrot.slane %v872_v26, 2  ;;  %v908_v31 = vadd.f32 %v907_v27, %v906_v18  ;;  %v867_v33 = vadd.f32 %v866_v23, %v865_v14  ;;  %v902_v39 = vrot.slane %v901_v24, 2  ;;  %v2485_v18 = vld [vmem:[#allocation11 + $0x174] ss:$8 sps:$4 sm:$0xff]   ;;  %v2491_v21 = vld [vmem:[#allocation11 + $0x164] ss:$8 sps:$4 sm:$0xff]   ;;  %1839 = vmatprep.subr.bf16.mxu1 %v2488_v20 }
 0x231   :  { %v921_v43 = vsel %vm235_vm0, %v917_v28, 0.0  ;;  %v933_v45 = vmul.f32 %v3158_v50, %v898_v29  ;;  %v936_v5 = vsel %vm235_vm0, %v932_v44, 0.0  ;;  %1892 = vmatprep.subr.bf16.mxu0 %v2485_v18  ;;  %v2486_v22 = vld [vmem:[#allocation11 + $0x70] ss:$8 sps:$4 sm:$0xff]   ;;  %v2489_v23 = vld [vmem:[#allocation11 + $0x160] ss:$8 sps:$4 sm:$0xff]  }
 0x232   :  { %v922_v46 = vadd.f32 %v921_v43, %v920_v42  ;;  %v868_v47 = vrot.slane %v867_v33, 1  ;;  %v874_v49 = vadd.f32 %v873_v30, %v872_v26  ;;  %v903_v51 = vadd.f32 %v902_v39, %v901_v24  ;;  %1893 = vmatpush1.bf16.msra.mxu0 %v2483_v19  ;;  %v2494_v24 = vld [vmem:[#allocation11 + $0x64] ss:$8 sps:$4 sm:$0xff]   ;;  %1840 = vmatpush1.bf16.msra.mxu1 %v2486_v22  ;;  %v2492_v26 = vld [vmem:[#allocation11 + $0x60] ss:$8 sps:$4 sm:$0xff]  }
 0x233   :  { %v937_v53 = vsel %vm235_vm0, %v933_v45, 0.0  ;;  %v909_v55 = vrot.slane %v908_v31, 2  ;;  %1894 = vmatprep.subr.bf16.mxu0 %v2491_v21  ;;  %v2495_v27 = vld [vmem:[#allocation11 + $0x150] ss:$8 sps:$4 sm:$0xff]   ;;  %v2497_v28 = vld [vmem:[#allocation11 + $0x154] ss:$8 sps:$4 sm:$0xff]   ;;  %1841 = vmatprep.subr.bf16.mxu1 %v2494_v24 }
 0x234   :  { %923 = vadd.xlane.f32.xlu1 %v922_v46  ;;  %v869_v56 = vadd.f32 %v868_v47, %v867_v33  ;;  %v875_v58 = vrot.slane %v874_v49, 1  ;;  %v904_v60 = vrot.slane %v903_v51, 1  ;;  %v938_v59 = vadd.f32 %v937_v53, %v936_v5  ;;  %v2500_v29 = vld [vmem:[#allocation11 + $0x54] ss:$8 sps:$4 sm:$0xff]   ;;  %v2503_v30 = vld [vmem:[#allocation11 + $0x144] ss:$8 sps:$4 sm:$0xff]  }
 0x235   :  { %v910_v61 = vadd.f32 %v909_v55, %v908_v31  ;;  %v2498_v31 = vld [vmem:[#allocation11 + $0x50] ss:$8 sps:$4 sm:$0xff]   ;;  %v2501_v33 = vld [vmem:[#allocation11 + $0x140] ss:$8 sps:$4 sm:$0xff]   ;;  %v2506_v39 = vld [vmem:[#allocation11 + $0x44] ss:$8 sps:$4 sm:$0xff]  }
 0x236   :  { %v876_v62 = vadd.f32 %v875_v58, %v874_v49  ;;  %v918_v63 = vmul.f32 %v869_v56, %v3148_v36  ;;  %v905_v1 = vadd.f32 %v904_v60, %v903_v51  ;;  %1895 = vmatpush1.bf16.msra.mxu0 %v2489_v23  ;;  %1842 = vmatpush1.bf16.msra.mxu1 %v2492_v26  ;;  %v2509_v42 = vld [vmem:[#allocation11 + $0x134] ss:$8 sps:$4 sm:$0xff]   ;;  %v2504_v43 = vld [vmem:[#allocation11 + $0x40] ss:$8 sps:$4 sm:$0xff]   ;;  %v2507_v44 = vld [vmem:[#allocation11 + $0x130] ss:$8 sps:$4 sm:$0xff]  }
 0x237   :  { %v911_v2 = vrot.slane %v910_v61, 1  ;;  %1896 = vmatprep.subr.bf16.mxu0 %v2497_v28  ;;  %1843 = vmatprep.subr.bf16.mxu1 %v2500_v29  ;;  %v2512_v45 = vld [vmem:[#allocation11 + $0x34] ss:$8 sps:$4 sm:$0xff]   ;;  %v2515_v46 = vld [vmem:[#allocation11 + $0x124] ss:$8 sps:$4 sm:$0xff]  }
 0x238   :  { %939 = vadd.xlane.f32.xlu1 %v938_v59  ;;  %v919_v3 = vmul.f32 %v3158_v50, %v876_v62  ;;  %v925_v9 = vsel %vm235_vm0, %v918_v63, 0.0  ;;  %v934_v11 = vmul.f32 %v905_v1, %v3148_v36  ;;  %v2510_v47 = vld [vmem:[#allocation11 + $0x30] ss:$8 sps:$4 sm:$0xff]   ;;  %v2513_v49 = vld [vmem:[#allocation11 + $0x120] ss:$8 sps:$4 sm:$0xff]  }
 0x239   :  { %v912_v7 = vadd.f32 %v911_v2, %v910_v61  ;;  %v2518_v51 = vld [vmem:[#allocation11 + $0x24] ss:$8 sps:$4 sm:$0xff]   ;;  %v2521_v53 = vld [vmem:[#allocation11 + $0x114] ss:$8 sps:$4 sm:$0xff]   ;;  %v2516_v55 = vld [vmem:[#allocation11 + $0x20] ss:$8 sps:$4 sm:$0xff]  }
 0x23a   :  { %v926_v10 = vsel %vm235_vm0, %v919_v3, 0.0  ;;  %v941_v16 = vsel %vm235_vm0, %v934_v11, 0.0  ;;  %1897 = vmatpush1.bf16.msra.mxu0 %v2495_v27  ;;  %1844 = vmatpush1.bf16.msra.mxu1 %v2498_v31  ;;  %v2519_v56 = vld [vmem:[#allocation11 + $0x110] ss:$8 sps:$4 sm:$0xff]   ;;  %v2524_v58 = vld [vmem:[#allocation11 + $0x14] ss:$8 sps:$4 sm:$0xff]  }
 0x23b   :  { %v927_v12 = vadd.f32 %v926_v10, %v925_v9  ;;  %v935_v13 = vmul.f32 %v3158_v50, %v912_v7  ;;  %1898 = vmatprep.subr.bf16.mxu0 %v2503_v30  ;;  %1845 = vmatprep.subr.bf16.mxu1 %v2506_v39  ;;  %v2527_v60 = vld [vmem:[#allocation11 + $0x104] ss:$8 sps:$4 sm:$0xff]   ;;  %v2522_v5 = vld [vmem:[#allocation11 + $0x10] ss:$8 sps:$4 sm:$0xff]   ;;  %v2525_v61 = vld [vmem:[#allocation11 + $0x100] ss:$8 sps:$4 sm:$0xff]  }
 0x23c   :  { %v2530_v59 = vld [vmem:[#allocation11 + $0x4] ss:$8 sps:$4 sm:$0xff]   ;;  %v2533_v62 = vld [vmem:[#allocation11 + $0x1f4] ss:$8 sps:$4 sm:$0xff]   ;;  %v2528_v63 = vld [vmem:[#allocation11] ss:$8 sps:$4 sm:$0xff]  }
 0x23d   :  { %928 = vadd.xlane.f32.xlu0 %v927_v12  ;;  %v942_v14 = vsel %vm235_vm0, %v935_v13, 0.0  ;;  %v2531_v1 = vld [vmem:[#allocation11 + $0x1f0] ss:$8 sps:$4 sm:$0xff]   ;;  %v2536_v2 = vld [vmem:[#allocation11 + $0xf4] ss:$8 sps:$4 sm:$0xff]  }
 0x23e   :  { %v943_v17 = vadd.f32 %v942_v14, %v941_v16  ;;  %1899 = vmatpush1.bf16.msra.mxu0 %v2501_v33  ;;  %1846 = vmatpush1.bf16.msra.mxu1 %v2504_v43  ;;  %v2539_v3 = vld [vmem:[#allocation11 + $0x1e4] ss:$8 sps:$4 sm:$0xff]   ;;  %v2534_v7 = vld [vmem:[#allocation11 + $0xf0] ss:$8 sps:$4 sm:$0xff]   ;;  %v2537_v9 = vld [vmem:[#allocation11 + $0x1e0] ss:$8 sps:$4 sm:$0xff]  }
 0x23f   :  { %1900 = vmatprep.subr.bf16.mxu0 %v2509_v42  ;;  %1847 = vmatprep.subr.bf16.mxu1 %v2512_v45  ;;  %v2542_v10 = vld [vmem:[#allocation11 + $0xe4] ss:$8 sps:$4 sm:$0xff]   ;;  %v2545_v11 = vld [vmem:[#allocation11 + $0x1d4] ss:$8 sps:$4 sm:$0xff]   ;;  %v2540_v12 = vld [vmem:[#allocation11 + $0xe0] ss:$8 sps:$4 sm:$0xff]  }
 0x240   :  { %v2543_v13 = vld [vmem:[#allocation11 + $0x1d0] ss:$8 sps:$4 sm:$0xff]   ;;  %v2548_v14 = vld [vmem:[#allocation11 + $0xd4] ss:$8 sps:$4 sm:$0xff]   ;;  %v2551_v16 = vld [vmem:[#allocation11 + $0x1c4] ss:$8 sps:$4 sm:$0xff]  }
 0x241   :  { %944 = vadd.xlane.f32.xlu0 %v943_v17  ;;  %v2546_v17 = vld [vmem:[#allocation11 + $0xd0] ss:$8 sps:$4 sm:$0xff]   ;;  %v2549_v18 = vld [vmem:[#allocation11 + $0x1c0] ss:$8 sps:$4 sm:$0xff]   ;;  %v2554_v19 = vld [vmem:[#allocation11 + $0xc4] ss:$8 sps:$4 sm:$0xff]  }
 0x242   :  { %1901 = vmatpush1.bf16.msra.mxu0 %v2507_v44  ;;  %1848 = vmatpush1.bf16.msra.mxu1 %v2510_v47  ;;  %v2557_v20 = vld [vmem:[#allocation11 + $0x1b4] ss:$8 sps:$4 sm:$0xff]   ;;  %v2552_v21 = vld [vmem:[#allocation11 + $0xc0] ss:$8 sps:$4 sm:$0xff]   ;;  %v2555_v22 = vld [vmem:[#allocation11 + $0x1b0] ss:$8 sps:$4 sm:$0xff]  }
 0x243   :  { %1902 = vmatprep.subr.bf16.mxu0 %v2515_v46  ;;  %1849 = vmatprep.subr.bf16.mxu1 %v2518_v51  ;;  %v2560_v23 = vld [vmem:[#allocation11 + $0xb4] ss:$8 sps:$4 sm:$0xff]   ;;  %v2563_v24 = vld [vmem:[#allocation11 + $0x1a4] ss:$8 sps:$4 sm:$0xff]   ;;  %v2558_v26 = vld [vmem:[#allocation11 + $0xb0] ss:$8 sps:$4 sm:$0xff]  }
 0x244   :  { %v2561_v27 = vld [vmem:[#allocation11 + $0x1a0] ss:$8 sps:$4 sm:$0xff]   ;;  %v2566_v28 = vld [vmem:[#allocation11 + $0xa4] ss:$8 sps:$4 sm:$0xff]   ;;  %v2569_v29 = vld [vmem:[#allocation11 + $0x194] ss:$8 sps:$4 sm:$0xff]  }
 0x245   :  { %v2564_v30 = vld [vmem:[#allocation11 + $0xa0] ss:$8 sps:$4 sm:$0xff]   ;;  %v2567_v31 = vld [vmem:[#allocation11 + $0x190] ss:$8 sps:$4 sm:$0xff]   ;;  %v2572_v33 = vld [vmem:[#allocation11 + $0x94] ss:$8 sps:$4 sm:$0xff]  }
 0x246   :  { %1903 = vmatpush1.bf16.msra.mxu0 %v2513_v49  ;;  %1850 = vmatpush1.bf16.msra.mxu1 %v2516_v55  ;;  %v2575_v39 = vld [vmem:[#allocation11 + $0x184] ss:$8 sps:$4 sm:$0xff]   ;;  %v2570_v42 = vld [vmem:[#allocation11 + $0x90] ss:$8 sps:$4 sm:$0xff]   ;;  %v2573_v43 = vld [vmem:[#allocation11 + $0x180] ss:$8 sps:$4 sm:$0xff]  }
 0x247   :  { %1904 = vmatprep.subr.bf16.mxu0 %v2521_v53  ;;  %1851 = vmatprep.subr.bf16.mxu1 %v2524_v58  ;;  %v2578_v44 = vld [vmem:[#allocation11 + $0x84] ss:$8 sps:$4 sm:$0xff]   ;;  %v2576_v45 = vld [vmem:[#allocation11 + $0x80] ss:$8 sps:$4 sm:$0xff]   ;;  %v2581_v46 = vld [vmem:[#allocation11 + $0x274] ss:$8 sps:$4 sm:$0xff]  }
 0x24a   :  { %1905 = vmatpush1.bf16.msra.mxu0 %v2519_v56  ;;  %1852 = vmatpush1.bf16.msra.mxu1 %v2522_v5 }
 0x24b   :  { %1906 = vmatprep.subr.bf16.mxu0 %v2527_v60  ;;  %1853 = vmatprep.subr.bf16.mxu1 %v2530_v59 }
 0x24e   :  { %1907 = vmatpush1.bf16.msra.mxu0 %v2525_v61  ;;  %1854 = vmatpush1.bf16.msra.mxu1 %v2528_v63 }
 0x24f   :  { %1908 = vmatprep.subr.bf16.mxu0 %v2533_v62  ;;  %1855 = vmatprep.subr.bf16.mxu1 %v2536_v2 }
 0x252   :  { %1909 = vmatpush2.bf16.msra.mxu0 %v2531_v1  ;;  %1856 = vmatpush2.bf16.msra.mxu1 %v2534_v7  ;;  %v2602_v1 = vld [vmem:[#allocation13 + $0x74] ss:$8 sps:$4 sm:$0xff]  }
 0x253   :  { %1910 = vmatprep.subr.bf16.mxu0 %v2539_v3  ;;  %1857 = vmatprep.subr.bf16.mxu1 %v2542_v10 }
 0x256   :  { %1911 = vmatpush2.bf16.msra.mxu0 %v2537_v9  ;;  %1858 = vmatpush2.bf16.msra.mxu1 %v2540_v12 }
 0x257   :  { %1912 = vmatprep.subr.bf16.mxu0 %v2545_v11  ;;  %1859 = vmatprep.subr.bf16.mxu1 %v2548_v14 }
 0x25a   :  { %1913 = vmatpush2.bf16.msra.mxu0 %v2543_v13  ;;  %1860 = vmatpush2.bf16.msra.mxu1 %v2546_v17 }
 0x25b   :  { %1914 = vmatprep.subr.bf16.mxu0 %v2551_v16  ;;  %1861 = vmatprep.subr.bf16.mxu1 %v2554_v19 }
 0x25e   :  { %1915 = vmatpush2.bf16.msra.mxu0 %v2549_v18  ;;  %1862 = vmatpush2.bf16.msra.mxu1 %v2552_v21 }
 0x25f   :  { %1916 = vmatprep.subr.bf16.mxu0 %v2557_v20  ;;  %1863 = vmatprep.subr.bf16.mxu1 %v2560_v23 }
 0x262   :  { %1917 = vmatpush2.bf16.msra.mxu0 %v2555_v22  ;;  %1864 = vmatpush2.bf16.msra.mxu1 %v2558_v26 }
 0x263   :  { %1918 = vmatprep.subr.bf16.mxu0 %v2563_v24  ;;  %1865 = vmatprep.subr.bf16.mxu1 %v2566_v28 }
 0x266   :  { %1919 = vmatpush2.bf16.msra.mxu0 %v2561_v27  ;;  %1866 = vmatpush2.bf16.msra.mxu1 %v2564_v30 }
 0x267   :  { %1920 = vmatprep.subr.bf16.mxu0 %v2569_v29  ;;  %1867 = vmatprep.subr.bf16.mxu1 %v2572_v33 }
 0x26a   :  { %1921 = vmatpush2.bf16.msra.mxu0 %v2567_v31  ;;  %1868 = vmatpush2.bf16.msra.mxu1 %v2570_v42 }
 0x26b   :  { %1922 = vmatprep.subr.bf16.mxu0 %v2575_v39  ;;  %1869 = vmatprep.subr.bf16.mxu1 %v2578_v44 }
 0x26e   :  { %1923 = vmatpush2.bf16.msra.mxu0 %v2573_v43  ;;  %1870 = vmatpush2.bf16.msra.mxu1 %v2576_v45 }
 0x26f   :  { %1945 = vmatprep.subr.bf16.mxu1 %v2581_v46  ;;  %2108 = vmatprep.subr.bf16.mxu0 %v2602_v1 }
 0x2bd   :  { %v924_v47 = vpop.xlane.xlu1 %923 }
 0x2be   :  { %v930_v49 = vmul.f32 0.0009765625, %v924_v47 }
 0x2c0   :  { %v948_v53 = vmul.f32 %v930_v49, %v930_v49  ;;  %v958_v12 = vmul.f32 %v930_v49, %v3148_v36  ;;  %v959_v13 = vmul.f32 %v930_v49, %v3158_v50 }
 0x2c1   :  { %v940_v51 = vpop.xlane.xlu1 %939 }
 0x2c2   :  { %v946_v55 = vmul.f32 0.0009765625, %v940_v51  ;;  %v962_v23 = vsel %vm235_vm0, %v958_v12, 0.0  ;;  %v969_v24 = vsel %vm235_vm0, %v959_v13, 0.0 }
 0x2c3   :  { %v963_v30 = vrot.slane %v962_v23, 4  ;;  %v970_v31 = vrot.slane %v969_v24, 4 }
 0x2c4   :  { %v950_v56 = vsub.f32 %v946_v55, %v948_v53 }
 0x2c5   :  { %v964_v47 = vadd.f32 %v963_v30, %v962_v23  ;;  %v971_v49 = vadd.f32 %v970_v31, %v969_v24 }
 0x2c6   :  { %v952_v58 = vmax.f32 %v950_v56, 0.0  ;;  %v929_v60 = vpop.xlane.xlu0 %928 }
 0x2c7   :  { %v931_v61 = vmul.f32 0.0009765625, %v929_v60 }
 0x2c8   :  { %v954_v5 = vadd.f32 1e-05, %v952_v58 }
 0x2c9   :  { %v949_v62 = vmul.f32 %v931_v61, %v931_v61  ;;  %v960_v9 = vmul.f32 %v931_v61, %v3148_v36  ;;  %v961_v10 = vmul.f32 %v931_v61, %v3158_v50 }
 0x2ca   :  { %2671 = vrsqrt.f32 %v954_v5  ;;  %v945_v59 = vpop.xlane.xlu0 %944 }
 0x2cb   :  { %v947_v63 = vmul.f32 0.0009765625, %v945_v59  ;;  %v976_v17 = vsel %vm235_vm0, %v960_v9, 0.0  ;;  %v983_v18 = vsel %vm235_vm0, %v961_v10, 0.0  ;;  %v965_v59 = vrot.slane %v964_v47, 2  ;;  %v1022_v10 = vld [vmem:[%s3383_s7] sm:$0x3] }
 0x2cc   :  { %v977_v26 = vrot.slane %v976_v17, 4  ;;  %v984_v27 = vrot.slane %v983_v18, 4 }
 0x2cd   :  { %v951_v2 = vsub.f32 %v947_v63, %v949_v62  ;;  %v972_v62 = vrot.slane %v971_v49, 2 }
 0x2ce   :  { %v978_v33 = vadd.f32 %v977_v26, %v976_v17  ;;  %v985_v39 = vadd.f32 %v984_v27, %v983_v18  ;;  %v1027_v18 = vrot.slane %v1022_v10, %v3045_v40 }
 0x2cf   :  { %v953_v3 = vmax.f32 %v951_v2, 0.0  ;;  %v973_v12 = vadd.f32 %v972_v62, %v971_v49 }
 0x2d0   :  { %v979_v51 = vrot.slane %v978_v33, 2  ;;  %v986_v53 = vrot.slane %v985_v39, 2 }
 0x2d1   :  { %v955_v7 = vadd.f32 1e-05, %v953_v3  ;;  %v974_v26 = vrot.slane %v973_v12, 1 }
 0x2d2   :  { %v980_v2 = vadd.f32 %v979_v51, %v978_v33 }
 0x2d3   :  { %2673 = vrsqrt.f32 %v955_v7 }
 0x2d7   :  { %v2672_v11 = vpop.eup %2671 }
 0x2d8   :  { %v990_v14 = vmul.f32 %v2672_v11, %v3148_v36  ;;  %v991_v16 = vmul.f32 %v2672_v11, %v3158_v50  ;;  %v966_v11 = vadd.f32 %v965_v59, %v964_v47 }
 0x2da   :  { %v994_v19 = vsel %vm235_vm0, %v990_v14, 0.0  ;;  %v1001_v20 = vsel %vm235_vm0, %v991_v16, 0.0  ;;  %v981_v16 = vrot.slane %v980_v2, 1  ;;  %v967_v24 = vrot.slane %v966_v11, 1 }
 0x2db   :  { %v995_v21 = vrot.slane %v994_v19, 4  ;;  %v1002_v22 = vrot.slane %v1001_v20, 4 }
 0x2dd   :  { %v996_v28 = vadd.f32 %v995_v21, %v994_v19  ;;  %v1003_v29 = vadd.f32 %v1002_v22, %v1001_v20  ;;  %v1031_v19 = vrot.slane %v1022_v10, %v3119_v57 }
 0x2df   :  { %v997_v43 = vrot.slane %v996_v28, 2  ;;  %v1004_v44 = vrot.slane %v1003_v29, 2 }
 0x2e0   :  { %v2674_v42 = vpop.eup %2673 }
 0x2e1   :  { %v992_v45 = vmul.f32 %v2674_v42, %v3148_v36  ;;  %v993_v46 = vmul.f32 %v2674_v42, %v3158_v50  ;;  %v998_v58 = vadd.f32 %v997_v43, %v996_v28  ;;  %v1005_v61 = vadd.f32 %v1004_v44, %v1003_v29  ;;  %v1038_v43 = vld [vmem:[%s3384_s8] sm:$0x3] }
 0x2e2   :  { %v987_v36 = vadd.f32 %v986_v53, %v985_v39  ;;  %v982_v29 = vadd.f32 %v981_v16, %v980_v2  ;;  %v968_v44 = vadd.f32 %v967_v24, %v966_v11  ;;  %v1047_v49 = vrot.slane %v1038_v43, %v3045_v40 }
 0x2e3   :  { %v1008_v55 = vsel %vm235_vm0, %v992_v45, 0.0  ;;  %v1015_v56 = vsel %vm235_vm0, %v993_v46, 0.0  ;;  %v999_v3 = vrot.slane %v998_v58, 1  ;;  %v1006_v9 = vrot.slane %v1005_v61, 1 }
 0x2e4   :  { %v1009_v60 = vrot.slane %v1008_v55, 4  ;;  %v1016_v5 = vrot.slane %v1015_v56, 4  ;;  %v988_v17 = vrot.slane %v987_v36, 1  ;;  %v975_v45 = vadd.f32 %v974_v26, %v973_v12 }
 0x2e5   :  { %v1000_v20 = vadd.f32 %v999_v3, %v998_v58  ;;  %v1007_v23 = vadd.f32 %v1006_v9, %v1005_v61  ;;  %v1051_v51 = vrot.slane %v1038_v43, %v3119_v57 }
 0x2e6   :  { %v1010_v63 = vadd.f32 %v1009_v60, %v1008_v55  ;;  %v1017_v1 = vadd.f32 %v1016_v5, %v1015_v56  ;;  %v989_v30 = vadd.f32 %v988_v17, %v987_v36 }
 0x2e7   :  { %v1034_v31 = vmul.f32 %v1027_v18, %v1000_v20  ;;  %v1035_v33 = vmul.f32 %v1031_v19, %v1007_v23 }
 0x2e8   :  { %v1011_v50 = vrot.slane %v1010_v63, 2  ;;  %v1018_v7 = vrot.slane %v1017_v1, 2 }
 0x2e9   :  { %v1039_v53 = vmul.f32 %v1034_v31, %v968_v44  ;;  %v1040_v55 = vmul.f32 %v1035_v33, %v975_v45 }
 0x2ea   :  { %v1012_v13 = vadd.f32 %v1011_v50, %v1010_v63  ;;  %v1019_v14 = vadd.f32 %v1018_v7, %v1017_v1  ;;  %v1073_v63 = vrot.slane %v1035_v33, %v3045_v40  ;;  %v1069_v1 = vrot.slane %v1034_v31, %v3045_v40 }
 0x2ec   :  { %v1013_v21 = vrot.slane %v1012_v13, 1  ;;  %v1020_v22 = vrot.slane %v1019_v14, 1  ;;  %v1083_v9 = vmul.f32 %v1073_v63, %v3125_v4  ;;  %v1085_v10 = vmul.f32 %v1073_v63, %v3135_v15 }
 0x2ed   :  { %v1082_v11 = vmul.f32 %v1069_v1, %v3123_v0 }
 0x2ee   :  { %v1014_v27 = vadd.f32 %v1013_v21, %v1012_v13  ;;  %v1021_v28 = vadd.f32 %v1020_v22, %v1019_v14  ;;  %v1084_v14 = vmul.f32 %v1069_v1, %v3127_v8 }
 0x2f0   :  { %v1036_v39 = vmul.f32 %v1027_v18, %v1014_v27  ;;  %v1037_v42 = vmul.f32 %v1031_v19, %v1021_v28 }
 0x2f2   :  { %v1041_v46 = vmul.f32 %v1036_v39, %v982_v29  ;;  %v1042_v47 = vmul.f32 %v1037_v42, %v989_v30  ;;  %v1077_v36 = vrot.slane %v1036_v39, %v3045_v40  ;;  %v1081_v3 = vrot.slane %v1037_v42, %v3045_v40 }
 0x2f4   :  { %v1058_v56 = vrot.slane %v1041_v46, 7  ;;  %v1060_v58 = vrot.slane %v1042_v47, 7  ;;  %v1087_v17 = vmul.f32 %v1081_v3, %v3150_v37  ;;  %v1088_v18 = vmul.f32 %v1077_v36, %v3154_v48 }
 0x2f5   :  { %v1089_v0 = vmul.f32 %v1081_v3, %v3166_v6  ;;  %v1086_v8 = vmul.f32 %v1077_v36, %v3143_v25 }
 0x2f6   :  { %v1059_v60 = vsel %vm317_vm1, %v1058_v56, %v1039_v53  ;;  %v1061_v5 = vsel %vm317_vm1, %v1060_v58, %v1040_v55 }
 0x2f7   :  { %v1064_v61 = vsub.f32 %v1047_v49, %v1059_v60  ;;  %v1065_v59 = vsub.f32 %v1051_v51, %v1061_v5 }
 0x2f9   :  { %v1092_v62 = vcombine.low %v1064_v61, %v1065_v59 }
 0x2fb   :  { %v1099_v2 = vrot.slane %v1092_v62, %v3041_v38 }
 0x2fd   :  { %v1107_v50 = vrot.slane %v1099_v2, %v3041_v38  ;;  %v1100_v7 = vcombine.high %v1099_v2, %v1099_v2 }
 0x2ff   :  { %v1118_v12 = vrot.slane %v1107_v50, %v3045_v40  ;;  %v1122_v13 = vrot.slane %v1107_v50, %v3119_v57  ;;  %v1114_v16 = vrot.slane %v1100_v7, %v3041_v38 }
 0x301   :  { %v1136_v19 = vadd.f32 %v1122_v13, %v1083_v9  ;;  %v3231_v20 = vadd.f32 %v1122_v13, %v1085_v10  ;;  %v3233_v4 = vadd.f32 %v1118_v12, %v1082_v11  ;;  %v3235_v15 = vadd.f32 %v1118_v12, %v1084_v14 }
 0x302   :  { %v1126_v21 = vrot.slane %v1114_v16, %v3045_v40  ;;  %v1130_v22 = vrot.slane %v1114_v16, %v3119_v57 }
 0x303   :  { %v1144_v38 = vsub.f32 0.0, %v1136_v19  ;;  %v1146_v37 = vsub.f32 0.0, %v3231_v20  ;;  %v1143_v48 = vsub.f32 0.0, %v3233_v4  ;;  %v1145_v23 = vsub.f32 0.0, %v3235_v15 }
 0x304   :  { %v1140_v24 = vadd.f32 %v1130_v22, %v1087_v17  ;;  %v3244_v26 = vadd.f32 %v1126_v21, %v1088_v18  ;;  %v3246_v27 = vadd.f32 %v1130_v22, %v1089_v0  ;;  %v3248_v28 = vadd.f32 %v1126_v21, %v1086_v8  ;;  %v2600_v21 = vld [vmem:[#allocation13 + $0x70] ss:$8 sps:$4 sm:$0xff]  }
 0x305   :  { %v1153_v6 = vmul.f32 1.442695, %v1144_v38  ;;  %v1157_v29 = vmul.f32 1.442695, %v1146_v37  ;;  %v1151_v30 = vmul.f32 1.442695, %v1143_v48 }
 0x306   :  { %v1155_v31 = vmul.f32 1.442695, %v1145_v23  ;;  %v1148_v33 = vsub.f32 0.0, %v1140_v24  ;;  %v1149_v25 = vsub.f32 0.0, %v3244_v26  ;;  %v1150_v39 = vsub.f32 0.0, %v3246_v27 }
 0x307   :  { %2675 = vpow2.f32 %v1153_v6  ;;  %v1147_v42 = vsub.f32 0.0, %v3248_v28  ;;  %v2608_v37 = vld [vmem:[#allocation13 + $0x64] ss:$8 sps:$4 sm:$0xff]  }
 0x308   :  { %2677 = vpow2.f32 %v1157_v29  ;;  %v1161_v43 = vmul.f32 1.442695, %v1148_v33  ;;  %v1163_v44 = vmul.f32 1.442695, %v1149_v25  ;;  %v1165_v45 = vmul.f32 1.442695, %v1150_v39 }
 0x309   :  { %2679 = vpow2.f32 %v1151_v30  ;;  %v1159_v46 = vmul.f32 1.442695, %v1147_v42  ;;  %v2614_v42 = vld [vmem:[#allocation13 + $0x54] ss:$8 sps:$4 sm:$0xff]  }
 0x30a   :  { %2681 = vpow2.f32 %v1155_v31 }
 0x30b   :  { %2683 = vpow2.f32 %v1161_v43 }
 0x30c   :  { %2685 = vpow2.f32 %v1163_v44 }
 0x30d   :  { %2687 = vpow2.f32 %v1165_v45 }
 0x30e   :  { %2689 = vpow2.f32 %v1159_v46 }
 0x314   :  { %v2676_v47 = vpop.eup %2675 }
 0x315   :  { %v2678_v49 = vpop.eup %2677  ;;  %v1168_v51 = vadd.f32 1.0, %v2676_v47 }
 0x316   :  { %v2680_v53 = vpop.eup %2679  ;;  %v1170_v55 = vadd.f32 1.0, %v2678_v49  ;;  %v2579_v49 = vld [vmem:[#allocation11 + $0x270] ss:$8 sps:$4 sm:$0xff]  }
 0x317   :  { %v2682_v56 = vpop.eup %2681  ;;  %2691 = vrcp.f32 %v1168_v51  ;;  %v1167_v58 = vadd.f32 1.0, %v2680_v53  ;;  %v2584_v53 = vld [vmem:[#allocation11 + $0x264] ss:$8 sps:$4 sm:$0xff]  }
 0x318   :  { %v2684_v60 = vpop.eup %2683  ;;  %2693 = vrcp.f32 %v1170_v55  ;;  %v1169_v5 = vadd.f32 1.0, %v2682_v56 }
 0x319   :  { %v2686_v61 = vpop.eup %2685  ;;  %2695 = vrcp.f32 %v1167_v58  ;;  %v1172_v59 = vadd.f32 1.0, %v2684_v60 }
 0x31a   :  { %v2688_v62 = vpop.eup %2687  ;;  %2697 = vrcp.f32 %v1169_v5  ;;  %v1173_v63 = vadd.f32 1.0, %v2686_v61  ;;  %v2612_v5 = vld [vmem:[#allocation13 + $0x50] ss:$8 sps:$4 sm:$0xff]  }
 0x31b   :  { %v2690_v1 = vpop.eup %2689  ;;  %v1174_v2 = vadd.f32 1.0, %v2688_v62  ;;  %2699 = vrcp.f32 %v1172_v59 }
 0x31c   :  { %2701 = vrcp.f32 %v1173_v63  ;;  %v1171_v36 = vadd.f32 1.0, %v2690_v1  ;;  %v2620_v63 = vld [vmem:[#allocation13 + $0x44] ss:$8 sps:$4 sm:$0xff]  }
 0x31d   :  { %2703 = vrcp.f32 %v1174_v2 }
 0x31e   :  { %2705 = vrcp.f32 %v1171_v36  ;;  %v2582_v36 = vld [vmem:[#allocation11 + $0x260] ss:$8 sps:$4 sm:$0xff]  }
 0x324   :  { %v2692_v3 = vpop.eup %2691 }
 0x325   :  { %v2694_v50 = vpop.eup %2693  ;;  %v3253_v7 = vmul.f32 %v2692_v3, %v1136_v19  ;;  %v2587_v3 = vld [vmem:[#allocation11 + $0x254] ss:$8 sps:$4 sm:$0xff]  }
 0x326   :  { %v2696_v9 = vpop.eup %2695  ;;  %v3256_v10 = vmul.f32 %v2694_v50, %v3231_v20 }
 0x327   :  { %v2698_v11 = vpop.eup %2697  ;;  %v1183_v12 = vmul.f32 %v2696_v9, %v3233_v4  ;;  %v1192_v19 = vrot.slane %v3253_v7, 7  ;;  %v1216_v50 = vrot.slane %v3253_v7, 1 }
 0x328   :  { %v2700_v13 = vpop.eup %2699  ;;  %v1242_v14 = vpack.c.bf16 %v3256_v10, %v3253_v7  ;;  %v3262_v16 = vmul.f32 %v2698_v11, %v3235_v15  ;;  %v1194_v0 = vrot.slane %v3256_v10, 7  ;;  %v1218_v9 = vrot.slane %v3256_v10, 1 }
 0x329   :  { %v2702_v17 = vpop.eup %2701  ;;  %v3264_v18 = vmul.f32 %v2700_v13, %v1140_v24  ;;  %v1191_v22 = vrot.slane %v1183_v12, 7  ;;  %v1215_v29 = vrot.slane %v1183_v12, 1  ;;  %v2618_v13 = vld [vmem:[#allocation13 + $0x40] ss:$8 sps:$4 sm:$0xff]  }
 0x32a   :  { %v2704_v20 = vpop.eup %2703  ;;  %1924 = vmatprep.mubr.bf16.mxu0 %v1242_v14  ;;  %v1193_v4 = vrot.slane %v3262_v16, 7  ;;  %v1241_v8 = vpack.c.bf16 %v3262_v16, %v1183_v12  ;;  %v1189_v38 = vmul.f32 %v2702_v17, %v3244_v26  ;;  %v1217_v30 = vrot.slane %v3262_v16, 1  ;;  %v2606_v26 = vld [vmem:[#allocation13 + $0x60] ss:$8 sps:$4 sm:$0xff]   ;;  %v2626_v16 = vld [vmem:[#allocation13 + $0x34] ss:$8 sps:$4 sm:$0xff]  }
 0x32b   :  { %v2706_v15 = vpop.eup %2705  ;;  %v3272_v48 = vmul.f32 %v2704_v20, %v3246_v27  ;;  %v1196_v23 = vrot.slane %v3264_v18, 7  ;;  %v1204_v27 = vsel %vm398_vm3, %v1192_v19, %v1194_v0  ;;  %v1220_v62 = vrot.slane %v3264_v18, 1  ;;  %v2585_v17 = vld [vmem:[#allocation11 + $0x250] ss:$8 sps:$4 sm:$0xff]  }
 0x32c   :  { %1925 = vmatmul.mubr.bf16.vlgmr.msra.gmra.mxu0 %v1241_v8  ;;  %v1197_v24 = vrot.slane %v1189_v38, 7  ;;  %v1187_v6 = vmul.f32 %v2706_v15, %v3248_v28  ;;  %v1203_v25 = vsel %vm398_vm3, %v1191_v22, %v1193_v4  ;;  %v3298_v55 = vsel %vm419_vm5, %v1215_v29, %v1217_v30  ;;  %v2624_v20 = vld [vmem:[#allocation13 + $0x30] ss:$8 sps:$4 sm:$0xff]   ;;  %v2593_v8 = vld [vmem:[#allocation11 + $0x234] ss:$8 sps:$4 sm:$0xff]  }
 0x32d   :  { %v1248_v31 = vpack.c.bf16 %v3272_v48, %v3264_v18  ;;  %v1198_v33 = vrot.slane %v3272_v48, 7  ;;  %2109 = vmatpush1.bf16.msra.mxu0 %v2600_v21  ;;  %v1202_v46 = vsel %vm398_vm3, %v1194_v0, %v1196_v23  ;;  %v1221_v56 = vrot.slane %v1189_v38, 1  ;;  %v2590_v0 = vld [vmem:[#allocation11 + $0x244] ss:$8 sps:$4 sm:$0xff]   ;;  %v2591_v15 = vld [vmem:[#allocation11 + $0x230] ss:$8 sps:$4 sm:$0xff]  }
 0x32e   :  { %v1205_v39 = vsel %vm398_vm3, %v1197_v24, %v1191_v22  ;;  %v1219_v28 = vrot.slane %v1187_v6, 1  ;;  %2110 = vmatprep.subr.bf16.mxu0 %v2608_v37  ;;  %v1195_v60 = vrot.slane %v1187_v6, 7  ;;  %v1247_v59 = vpack.c.bf16 %v1189_v38, %v1187_v6  ;;  %v2632_v22 = vld [vmem:[#allocation13 + $0x24] ss:$8 sps:$4 sm:$0xff]   ;;  %v2630_v38 = vld [vmem:[#allocation13 + $0x20] ss:$8 sps:$4 sm:$0xff]  }
 0x32f   :  { %1934 = vmatprep.mubr.bf16.mxu0 %v1248_v31  ;;  %v1206_v43 = vsel %vm398_vm3, %v1198_v33, %v1192_v19  ;;  %v2359_v44 = vpack.c.bf16 %v1203_v25, %v1205_v39  ;;  %v1200_v45 = vsel %vm398_vm3, %v1196_v23, %v1198_v33  ;;  %v3313_v2 = vsel %vm419_vm5, %v1221_v56, %v1215_v29  ;;  %v2638_v37 = vld [vmem:[#allocation13 + $0x14] ss:$8 sps:$4 sm:$0xff]   ;;  %v2596_v23 = vld [vmem:[#allocation11 + $0x224] ss:$8 sps:$4 sm:$0xff]   ;;  %v2594_v6 = vld [vmem:[#allocation11 + $0x220] ss:$8 sps:$4 sm:$0xff]  }
 0x330   :  { %v2356_v47 = vpack.c.bf16 %v1204_v27, %v1206_v43  ;;  %v3294_v51 = vsel %vm419_vm5, %v1217_v30, %v1219_v28  ;;  %v2362_v58 = vpack.c.bf16 %v1200_v45, %v1202_v46  ;;  %v3309_v1 = vsel %vm419_vm5, %v1219_v28, %v1221_v56  ;;  %v2599_v29 = vld [vmem:[#allocation11 + $0x214] ss:$8 sps:$4 sm:$0xff]   ;;  %v2642_v30 = vld [vmem:[#allocation13] ss:$8 sps:$4 sm:$0xff]   ;;  %v2597_v31 = vld [vmem:[#allocation11 + $0x210] ss:$8 sps:$4 sm:$0xff]  }
 0x331   :  { %2111 = vmatpush1.bf16.msra.mxu0 %v2606_v26  ;;  %v2371_v61 = vpack.c.bf16 %v3294_v51, %v3298_v55  ;;  %v2377_v35 = vpack.c.bf16 %v3313_v2, %v3309_v1  ;;  %v1199_v11 = vsel %vm398_vm3, %v1195_v60, %v1197_v24  ;;  %v1201_v12 = vsel %vm398_vm3, %v1193_v4, %v1195_v60  ;;  %v2588_v4 = vld [vmem:[#allocation11 + $0x240] ss:$8 sps:$4 sm:$0xff]   ;;  %v2644_v24 = vld [vmem:[#allocation13 + $0x4] ss:$8 sps:$4 sm:$0xff]   ;;  %v2707_v26 = vld [vmem:[#allocation2] sm:$0xff] }
 0x332   :  { %2357 = vmatprep.mubr.msk.bf16.mxu1 %vm3075_vm7, %v2356_v47  ;;  %2112 = vmatprep.subr.bf16.mxu0 %v2614_v42  ;;  %v1226_v14 = vsel %vm419_vm5, %v1218_v9, %v1220_v62  ;;  %v2365_v10 = vpack.c.bf16 %v1199_v11, %v1201_v12  ;;  %v1228_v19 = vsel %vm419_vm5, %v1216_v50, %v1218_v9  ;;  %v2605_v33 = vld [vmem:[#allocation11 + $0x204] ss:$8 sps:$4 sm:$0xff]   ;;  %v2603_v39 = vld [vmem:[#allocation11 + $0x200] ss:$8 sps:$4 sm:$0xff]   ;;  %v2611_v28 = vld [vmem:[#allocation11 + $0x2f4] ss:$8 sps:$4 sm:$0xff]  }
 0x333   :  { %2360 = vmatmul.mubr.msk.bf16.vlgmr.msra.gmra.mxu1 %vm3075_vm7, %v2359_v44  ;;  %v2368_v21 = vpack.c.bf16 %v1226_v14, %v1228_v19  ;;  %v2708_v27 = vld [vmem:[#allocation2 + $0x8] sm:$0xff]  ;;  %v2609_v42 = vld [vmem:[#allocation11 + $0x2f0] ss:$8 sps:$4 sm:$0xff]   ;;  %v2709_v44 = vld [vmem:[#allocation2 + $0x10] sm:$0xff]  ;;  %v1222_v9 = vrot.slane %v3272_v48, 1 }
 0x334   :  { %1946 = vmatpush1.bf16.msra.mxu1 %v2579_v49  ;;  %2363 = vmatprep.mubr.msk.bf16.mxu1 %vm3102_vm11, %v2362_v58  ;;  %v1998_v25 = vpack.c.bf16 %v2708_v27, %v2707_v26  ;;  %v2617_v43 = vld [vmem:[#allocation11 + $0x2e4] ss:$8 sps:$4 sm:$0xff]   ;;  %v2710_v45 = vld [vmem:[#allocation2 + $0x18] sm:$0xff]  ;;  %v2615_v47 = vld [vmem:[#allocation11 + $0x2e0] ss:$8 sps:$4 sm:$0xff]  }
 0x335   :  { %1935 = vmatmul.mubr.bf16.gmra.mxu0 %v1247_v59  ;;  %1947 = vmatprep.subr.bf16.mxu1 %v2584_v53  ;;  %v1999_v46 = vpack.c.bf16 %v2710_v45, %v2709_v44  ;;  %v2623_v49 = vld [vmem:[#allocation11 + $0x2d4] ss:$8 sps:$4 sm:$0xff]   ;;  %v2621_v53 = vld [vmem:[#allocation11 + $0x2d0] ss:$8 sps:$4 sm:$0xff]   ;;  %v2629_v56 = vld [vmem:[#allocation11 + $0x2c4] ss:$8 sps:$4 sm:$0xff]   ;;  %v1224_v12 = vsel %vm419_vm5, %v1220_v62, %v1222_v9 }
 0x336   :  { %2113 = vmatpush1.bf16.msra.mxu0 %v2612_v5  ;;  %2140 = vmatprep.mubr.bf16.mxu0 %v2890_v34  ;;  %v2627_v58 = vld [vmem:[#allocation11 + $0x2c0] ss:$8 sps:$4 sm:$0xff]   ;;  %v2633_v60 = vld [vmem:[#allocation11 + $0x2b0] ss:$8 sps:$4 sm:$0xff]   ;;  %v2641_v5 = vld [vmem:[#allocation11 + $0x2a4] ss:$8 sps:$4 sm:$0xff]  }
 0x337   :  { %2114 = vmatprep.subr.bf16.mxu0 %v2620_v63  ;;  %v2639_v59 = vld [vmem:[#allocation11 + $0x2a0] ss:$8 sps:$4 sm:$0xff]   ;;  %v2647_v63 = vld [vmem:[#allocation11 + $0x294] ss:$8 sps:$4 sm:$0xff]  }
 0x338   :  { %1948 = vmatpush1.bf16.msra.mxu1 %v2582_v36  ;;  %v2645_v36 = vld [vmem:[#allocation11 + $0x290] ss:$8 sps:$4 sm:$0xff]   ;;  %v2648_v11 = vld [vmem:[#allocation11 + $0x280] ss:$8 sps:$4 sm:$0xff]  }
 0x339   :  { %1949 = vmatprep.subr.bf16.mxu1 %v2587_v3  ;;  %v2650_v3 = vld [vmem:[#allocation11 + $0x284] ss:$8 sps:$4 sm:$0xff]  }
 0x33a   :  { %2115 = vmatpush1.bf16.msra.mxu0 %v2618_v13  ;;  %v1230_v13 = vsel %vm419_vm5, %v1222_v9, %v1216_v50 }
 0x33b   :  { %2366 = vmatmul.mubr.msk.bf16.gmra.mxu1 %vm3102_vm11, %v2365_v10  ;;  %2116 = vmatprep.subr.bf16.mxu0 %v2626_v16  ;;  %v2374_v14 = vpack.c.bf16 %v1230_v13, %v1224_v12 }
 0x33c   :  { %1950 = vmatpush1.bf16.msra.mxu1 %v2585_v17  ;;  %2369 = vmatprep.mubr.msk.bf16.mxu1 %vm3084_vm8, %v2368_v21 }
 0x33d   :  { %1951 = vmatprep.subr.bf16.mxu1 %v2590_v0  ;;  %v2016_v0 = vld [vmem:[%s3388_s12] sm:$0x3]  ;;  %s2182_s12 = sshll.u32 %s2893_s10, 4  ;;  %s2183_s12 = int_to_ptr.vmem [resolvable:$true] %s2182_s12 }
 0x33e   :  { %2117 = vmatpush1.bf16.msra.mxu0 %v2624_v20  ;;  %v1356_v20 = vrot.slane %v1347_v54, %v3119_v57  ;;  %s2851_s29 = scalar_lea.vmem %s2183_s12, 1024  ;;  %p2856_p8 = scmp.lt.s32.totalorder %s2183_s12, %s2183_s12 }
 0x33f   :  { %2118 = vmatprep.subr.bf16.mxu0 %v2632_v22  ;;  %p2852_p7 = scmp.ne.s32.totalorder %s2183_s12, %s2851_s29  ;;  %p2857_p9 = scmp.lt.s32.totalorder %s2851_s29, %s2851_s29 }
 0x340   :  { %1952 = vmatpush1.bf16.msra.mxu1 %v2588_v4 }
 0x341   :  { %1953 = vmatprep.subr.bf16.mxu1 %v2593_v8  ;;  %v2021_v8 = vrot.slane %v2016_v0, %v3045_v40  ;;  %p2858_p10 = por %p2857_p9, %p2856_p8 }
 0x342   :  { %2119 = vmatpush1.bf16.msra.mxu0 %v2630_v38 }
 0x343   :  { %2120 = vmatprep.subr.bf16.mxu0 %v2638_v37  ;;  %p2859_p11 = pnand %p2858_p10, %p2852_p7 }
 0x344   :  { %1954 = vmatpush1.bf16.msra.mxu1 %v2591_v15 }
 0x345   :  { %1955 = vmatprep.subr.bf16.mxu1 %v2596_v23 }
 0x346   :  { %2121 = vmatpush1.bf16.msra.mxu0 %v2636_v52 }
 0x347   :  { %2122 = vmatprep.subr.bf16.mxu0 %v2644_v24  ;;  %v2025_v24 = vrot.slane %v2016_v0, %v3119_v57 }
 0x348   :  { %1956 = vmatpush1.bf16.msra.mxu1 %v2594_v6 }
 0x349   :  { %1957 = vmatprep.subr.bf16.mxu1 %v2599_v29 }
 0x34a   :  { %2123 = vmatpush1.bf16.msra.mxu0 %v2642_v30 }
 0x34c   :  { %1958 = vmatpush1.bf16.msra.mxu1 %v2597_v31 }
 0x34d   :  { %1959 = vmatprep.subr.bf16.mxu1 %v2605_v33  ;;  %2141 = vmatmul.mubr.bf16.vlgmr.msra.gmra.mxu0 %v1998_v25 }
 0x34e   :  { %2150 = vmatprep.mubr.bf16.mxu0 %v2890_v34  ;;  %v2635_v34 = vld [vmem:[#allocation11 + $0x2b4] ss:$8 sps:$4 sm:$0xff]  }
 0x350   :  { %1960 = vmatpush1.bf16.msra.mxu1 %v2603_v39 }
 0x351   :  { %1961 = vmatprep.subr.bf16.mxu1 %v2611_v28 }
 0x354   :  { %1962 = vmatpush2.bf16.msra.mxu1 %v2609_v42 }
 0x355   :  { %1963 = vmatprep.subr.bf16.mxu1 %v2617_v43  ;;  %2151 = vmatmul.mubr.bf16.gmra.mxu0 %v1999_v46 }
 0x358   :  { %1964 = vmatpush2.bf16.msra.mxu1 %v2615_v47 }
 0x359   :  { %1965 = vmatprep.subr.bf16.mxu1 %v2623_v49 }
 0x35c   :  { %1966 = vmatpush2.bf16.msra.mxu1 %v2621_v53 }
 0x35d   :  { %1967 = vmatprep.subr.bf16.mxu1 %v2629_v56 }
 0x360   :  { %1968 = vmatpush2.bf16.msra.mxu1 %v2627_v58 }
 0x361   :  { %1969 = vmatprep.subr.bf16.mxu1 %v2635_v34 }
 0x364   :  { %1970 = vmatpush2.bf16.msra.mxu1 %v2633_v60 }
 0x365   :  { %1971 = vmatprep.subr.bf16.mxu1 %v2641_v5 }
 0x368   :  { %1972 = vmatpush2.bf16.msra.mxu1 %v2639_v59 }
 0x369   :  { %1973 = vmatprep.subr.bf16.mxu1 %v2647_v63 }
 0x36c   :  { %1974 = vmatpush2.bf16.msra.mxu1 %v2645_v36 }
 0x36d   :  { %1975 = vmatprep.subr.bf16.mxu1 %v2650_v3 }
 0x370   :  { %1976 = vmatpush2.bf16.msra.mxu1 %v2648_v11 }
 0x373   :  { %2372 = vmatmul.mubr.msk.bf16.vlgmr.msra.gmra.mxu1 %vm3084_vm8, %v2371_v61 }
 0x374   :  { %2375 = vmatprep.mubr.msk.bf16.mxu1 %vm3107_vm12, %v2374_v14 }
 0x37b   :  { %2378 = vmatmul.mubr.msk.bf16.gmra.mxu1 %vm3107_vm12, %v2377_v35  ;;  %v1352_v35 = vrot.slane %v1347_v54, %v3045_v40 }
 0x3ec   :  { %v1926_v7 = vpop.f32.mrf.mxu0 }
 0x3ee   :  { %v1928_v32 = vpop.f32.mrf.mxu0 }
 0x3f0   :  { %v1930_v18 = vpop.f32.mrf.mxu0 }
 0x3f2   :  { %v1932_v48 = vpop.f32.mrf.mxu0 }
 0x3f3   :  { %v1873_v62 = vpop.f32.mrf.mxu1 }
 0x3f4   :  { %v1874_v4 = vadd.f32 %v1873_v62, %v1352_v35 }
 0x3f5   :  { %v1936_v50 = vpop.f32.mrf.mxu0  ;;  %v1875_v16 = vpop.f32.mrf.mxu1 }
 0x3f6   :  { %v1876_v37 = vadd.f32 %v1875_v16, %v1356_v20  ;;  %v1927_v6 = vadd.f32 %v1926_v7, %v1874_v4 }
 0x3f7   :  { %v1938_v51 = vpop.f32.mrf.mxu0  ;;  %v1877_v55 = vpop.f32.mrf.mxu1 }
 0x3f8   :  { %v1878_v23 = vadd.f32 %v1877_v55, %v1352_v35  ;;  %v1929_v26 = vadd.f32 %v1928_v32, %v1876_v37 }
 0x3f9   :  { %v1940_v41 = vpop.f32.mrf.mxu0  ;;  %v1879_v61 = vpop.f32.mrf.mxu1 }
 0x3fa   :  { %v1880_v29 = vadd.f32 %v1879_v61, %v1356_v20  ;;  %v1931_v43 = vadd.f32 %v1930_v18, %v1878_v23 }
 0x3fb   :  { %v3360_v17 = vpop.f32.mrf.mxu0  ;;  %v1883_v19 = vpop.f32.mrf.mxu1 }
 0x3fc   :  { %v1884_v27 = vadd.f32 %v1883_v19, %v1352_v35  ;;  %v1933_v45 = vadd.f32 %v1932_v48, %v1880_v29 }
 0x3fd   :  { %v1885_v2 = vpop.f32.mrf.mxu1 }
 0x3fe   :  { %v1886_v46 = vadd.f32 %v1885_v2, %v1356_v20  ;;  %v1937_v58 = vadd.f32 %v1936_v50, %v1884_v27 }
 0x3ff   :  { %v1887_v22 = vpop.f32.mrf.mxu1 }
 0x400   :  { %v1888_v53 = vadd.f32 %v1887_v22, %v1352_v35  ;;  %v1939_v12 = vadd.f32 %v1938_v51, %v1886_v46 }
 0x401   :  { %v1889_v15 = vpop.f32.mrf.mxu1 }
 0x402   :  { %v1890_v3 = vadd.f32 %v1889_v15, %v1356_v20  ;;  %v1941_v18 = vadd.f32 %v1940_v41, %v1888_v53 }
 0x404   :  { %v1943_v61 = vadd.f32 %v3360_v17, %v1890_v3 }
 0x40d   :  { %v2142_v10 = vpop.f32.mrf.mxu0 }
 0x40e   :  { %v2143_v52 = vadd.f32 %v2142_v10, %v2021_v8 }
 0x40f   :  { %v2144_v1 = vpop.f32.mrf.mxu0 }
 0x410   :  { %v2145_v39 = vadd.f32 %v2144_v1, %v2025_v24 }
 0x411   :  { %v2146_v21 = vpop.f32.mrf.mxu0 }
 0x412   :  { %v2147_v47 = vadd.f32 %v2146_v21, %v2021_v8 }
 0x413   :  { %v2148_v38 = vpop.f32.mrf.mxu0 }
 0x414   :  { %v2149_v34 = vadd.f32 %v2148_v38, %v2025_v24 }
 0x415   :  { %v2152_v31 = vpop.f32.mrf.mxu0 }
 0x416   :  { %v2153_v60 = vadd.f32 %v2152_v31, %v2021_v8 }
 0x417   :  { %v2154_v44 = vpop.f32.mrf.mxu0 }
 0x418   :  { %v2155_v14 = vadd.f32 %v2154_v44, %v2025_v24 }
 0x419   :  { %v2156_v63 = vpop.f32.mrf.mxu0 }
 0x41a   :  { %v2157_v50 = vadd.f32 %v2156_v63, %v2021_v8 }
 0x41b   :  { %v2158_v48 = vpop.f32.mrf.mxu0 }
 0x41c   :  { %v2159_v19 = vadd.f32 %v2158_v48, %v2025_v24 }
 0x433   :  { %v1979_v30 = vpop.f32.mrf.mxu1 }
 0x434   :  { %v1980_v33 = vadd.f32 %v1979_v30, %v1927_v6 }
 0x435   :  { %v1981_v25 = vpop.f32.mrf.mxu1 }
 0x436   :  { %v2161_v28 = vadd.f32 %v2143_v52, %v1980_v33  ;;  %v1982_v42 = vadd.f32 %v1981_v25, %v1929_v26 }
 0x437   :  { %v1983_v40 = vpop.f32.mrf.mxu1 }
 0x438   :  { %2169 = vst [vmem:[#allocation14] sm:$0xff] %v2161_v28  ;;  %v2162_v49 = vadd.f32 %v2145_v39, %v1982_v42  ;;  %v1984_v57 = vadd.f32 %v1983_v40, %v1931_v43 }
 0x439   :  { %v1985_v56 = vpop.f32.mrf.mxu1 }
 0x43a   :  { %2170 = vst [vmem:[#allocation14 + $0x8] sm:$0xff] %v2162_v49  ;;  %v2163_v5 = vadd.f32 %v2147_v47, %v1984_v57  ;;  %v1986_v59 = vadd.f32 %v1985_v56, %v1933_v45 }
 0x43b   :  { %v1989_v36 = vpop.f32.mrf.mxu1 }
 0x43c   :  { %2171 = vst [vmem:[#allocation14 + $0x10] sm:$0xff] %v2163_v5  ;;  %v2164_v9 = vadd.f32 %v2149_v34, %v1986_v59  ;;  %v1990_v11 = vadd.f32 %v1989_v36, %v1937_v58 }
 0x43d   :  { %v1991_v13 = vpop.f32.mrf.mxu1 }
 0x43e   :  { %2172 = vst [vmem:[#allocation14 + $0x18] sm:$0xff] %v2164_v9  ;;  %v2165_v7 = vadd.f32 %v2153_v60, %v1990_v11  ;;  %v1992_v32 = vadd.f32 %v1991_v13, %v1939_v12 }
 0x43f   :  { %v1993_v62 = vpop.f32.mrf.mxu1 }
 0x440   :  { %2173 = vst [vmem:[#allocation14 + $0x20] sm:$0xff] %v2165_v7  ;;  %v2166_v16 = vadd.f32 %v2155_v14, %v1992_v32  ;;  %v1994_v55 = vadd.f32 %v1993_v62, %v1941_v18 }
 0x441   :  { %v1995_v10 = vpop.f32.mrf.mxu1 }
 0x442   :  { %2174 = vst [vmem:[#allocation14 + $0x28] sm:$0xff] %v2166_v16  ;;  %v2167_v51 = vadd.f32 %v2157_v50, %v1994_v55  ;;  %v1996_v54 = vadd.f32 %v1995_v10, %v1943_v61 }
 0x444   :  { %2175 = vst [vmem:[#allocation14 + $0x30] sm:$0xff] %v2167_v51  ;;  %v2168_v1 = vadd.f32 %v2159_v19, %v1996_v54 }
 0x446   :  { %2176 = vst [vmem:[#allocation14 + $0x38] sm:$0xff] %v2168_v1 }
 0x447   :  { %2862 = shalt.err (!%p2859_p11)
}
 0x448   :  { %s2894_s30 = smov 256   ;;  %s2895_s14 = smov 16  }
 0x449   :  { %2188 = dma.vmem_to_hbm [thread:$0]  %s2183_s12, 1024, %s3389_s13, [#allocation4], %s2894_s30, %s2894_s30, %s2895_s14  }
 0x44a   :  { %2879 = dma.done.wait [#allocation4], 1024  }
 0x44b   :  { %2880 = vsyncadd [#allocation4], 4294966272 }
 0x44c   :  { %2192 = vsyncpa [#allocation3], 1 }
 0x44d   :  { %2193 = vsyncpa [#allocation6], 1 }
 0x44e   :  { %2194 = vsyncpa [#allocation9], 1 }
 0x44f   :  { %2195 = vsyncpa [#allocation12], 1 }
 0x450   :  { %2196 = vsyncpa [#allocation4], 1 }

</bundles_post_ra>
